<compile_context>
chip_gen: v7x
topology: tpu7x:2x2x1
jax: 0.10.0
libtpu: 0.0.40
codegen_flags: <defaults>
</compile_context>

<pallas_src>
import jax
import jax.numpy as jnp
import numpy as np
from jax.experimental import pallas as pl
from jax.experimental.pallas import tpu as pltpu

COND_SIZ = 8
HIDDEN_SIZ = 512
N_CLASSES = 29
N_LABELS = 4
SEQ_LEN = 1

NC = 4                       # hidden-dim chunks = grid size
HC = HIDDEN_SIZ // NC        # 128 hidden units per chunk (one lane tile)
GC = 4 * HC                  # gate columns per chunk ([i|f|g|o] for the slice)


# ----------------------------------------------------------------------------
# In-kernel helpers
# ----------------------------------------------------------------------------
def _onehot(ids, n):
    """(B,1) int32 ids -> (B,n) f32 one-hot (exact)."""
    b = ids.shape[0]
    col = jax.lax.broadcasted_iota(jnp.int32, (b, n), 1)
    return (col == ids).astype(jnp.float32)


def _gather(onehot, table_ref):
    """Exact row gather via one-hot matmul (f32 products of {0,1} are exact)."""
    return jnp.dot(onehot, table_ref[...], preferred_element_type=jnp.float32)


def _cell_update(gates, c_prev):
    """PyTorch LSTM cell epilogue for one hidden chunk (gate order i,f,g,o)."""
    hc = gates.shape[-1] // 4
    i = jax.nn.sigmoid(gates[:, 0 * hc:1 * hc])
    f = jax.nn.sigmoid(gates[:, 1 * hc:2 * hc])
    g = jnp.tanh(gates[:, 2 * hc:3 * hc])
    o = jax.nn.sigmoid(gates[:, 3 * hc:4 * hc])
    c_new = f * c_prev + i * g
    h_new = o * jnp.tanh(c_new)
    return h_new, c_new


# ----------------------------------------------------------------------------
# Kernels (grid axis = hidden chunk j; weights gate-permuted per chunk)
# ----------------------------------------------------------------------------
def _enc_label_kernel(xid_ref, labid_ref, h_ref,
                      emb_ref, labtab_ref, labtab_c_ref,
                      wfch_ref, wfch_c_ref, wcat_ref, bcat_ref,
                      hout_ref, cout_ref):
    x_oh = _onehot(xid_ref[...], N_CLASSES)
    l_oh = _onehot(labid_ref[...], N_LABELS)

    x_emb = _gather(x_oh, emb_ref)                                   # (B, H) f32
    h_bf = h_ref[...].astype(jnp.bfloat16)

    # Full h0 = init_cond_fc(cat(hidden, label_emb)); label half + bias were
    # folded offline into lab_table, so only the HxH part hits the MXU.
    h0_full = (jnp.dot(h_bf, wfch_ref[...], preferred_element_type=jnp.float32)
               + _gather(l_oh, labtab_ref))                          # (B, H)
    # This chunk's slice of h0 (== cell-state init for this hidden slice);
    # computed from the chunked column views, bitwise equal to h0_full[:, j].
    c_prev = (jnp.dot(h_bf, wfch_c_ref[...], preferred_element_type=jnp.float32)
              + _gather(l_oh, labtab_c_ref))                         # (B, HC)

    xh = jnp.concatenate([x_emb.astype(jnp.bfloat16),
                          h0_full.astype(jnp.bfloat16)], axis=1)     # (B, 2H) bf16
    gates = (jnp.dot(xh, wcat_ref[...], preferred_element_type=jnp.float32)
             + bcat_ref[...])                                        # (B, 4*HC)
    h_new, c_new = _cell_update(gates, c_prev)
    hout_ref[...] = h_new
    cout_ref[...] = c_new


def _enc_nolabel_kernel(xid_ref, h_ref, c_ref,
                        emb_ref, wcat_ref, bcat_ref,
                        hout_ref, cout_ref):
    x_oh = _onehot(xid_ref[...], N_CLASSES)
    x_emb = _gather(x_oh, emb_ref)                                   # (B, H) f32
    xh = jnp.concatenate([x_emb.astype(jnp.bfloat16),
                          h_ref[...].astype(jnp.bfloat16)], axis=1)  # (B, 2H)
    gates = (jnp.dot(xh, wcat_ref[...], preferred_element_type=jnp.float32)
             + bcat_ref[...])                                        # (B, 4*HC)
    h_new, c_new = _cell_update(gates, c_ref[...])
    hout_ref[...] = h_new
    cout_ref[...] = c_new


# ----------------------------------------------------------------------------
# pallas_call wrappers
# ----------------------------------------------------------------------------
# Working set: 2x1 MiB double-buffered weight chunk + 0.5 MiB fc_w_h + small
# tables/activations (< 3 MiB).  "parallel" lets v7x shard the 4 chunks across
# its 2 TensorCores; no effect on single-TC v5e/v6e.
_cparams = pltpu.CompilerParams(
    dimension_semantics=("parallel",),
    vmem_limit_bytes=16 << 20,
)


def _const(shape):
    return pl.BlockSpec(shape, lambda j: (0, 0))     # DMA'd once, VMEM-resident


def _chunked(shape):
    return pl.BlockSpec(shape, lambda j: (0, j))     # streamed per hidden chunk


def _call(kernel, in_specs, args, batch):
    out_shape = (jax.ShapeDtypeStruct((batch, HIDDEN_SIZ), jnp.float32),
                 jax.ShapeDtypeStruct((batch, HIDDEN_SIZ), jnp.float32))
    grid_spec = pltpu.PrefetchScalarGridSpec(
        num_scalar_prefetch=0,
        grid=(NC,),
        in_specs=in_specs,
        out_specs=(_chunked((batch, HC)), _chunked((batch, HC))),
    )
    return pl.pallas_call(kernel, out_shape=out_shape, grid_spec=grid_spec,
                          compiler_params=_cparams)(*args)


@jax.jit
def encoder_forward(params, x, hidden_state=None, cell_state=None, label=None):
    """Mirrors Encoder.forward. x: (B,) int tokens; states: (1, B, HIDDEN)."""
    batch = x.shape[0]
    x_ids = x.astype(jnp.int32).reshape(batch, 1)
    h = hidden_state.reshape(batch, HIDDEN_SIZ)

    if label is not None:
        lab_ids = label.astype(jnp.int32).reshape(batch, 1)
        in_specs = [
            _const((batch, 1)),                      # token ids
            _const((batch, 1)),                      # label ids
            _const((batch, HIDDEN_SIZ)),             # hidden state (full K)
            _const((N_CLASSES, HIDDEN_SIZ)),         # input embedding table
            _const((N_LABELS, HIDDEN_SIZ)),          # folded label table (full)
            _chunked((N_LABELS, HC)),                # folded label table (chunk)
            _const((HIDDEN_SIZ, HIDDEN_SIZ)),        # fc_w_h (full)
            _chunked((HIDDEN_SIZ, HC)),              # fc_w_h (chunk)
            _chunked((2 * HIDDEN_SIZ, GC)),          # [w_ih;w_hh] gate-permuted
            _chunked((1, GC)),                       # lstm bias gate-permuted
        ]
        args = (x_ids, lab_ids, h,
                params["input_embedding"],
                params["lab_table"], params["lab_table"],
                params["fc_w_h"], params["fc_w_h"],
                params["w_cat"], params["b_cat"])
        h_new, c_new = _call(_enc_label_kernel, in_specs, args, batch)
    else:
        c = cell_state.reshape(batch, HIDDEN_SIZ)
        in_specs = [
            _const((batch, 1)),
            _const((batch, HIDDEN_SIZ)),
            _chunked((batch, HC)),                   # cell state, sliced per chunk
            _const((N_CLASSES, HIDDEN_SIZ)),
            _chunked((2 * HIDDEN_SIZ, GC)),
            _chunked((1, GC)),
        ]
        args = (x_ids, h, c, params["input_embedding"],
                params["w_cat"], params["b_cat"])
        h_new, c_new = _call(_enc_nolabel_kernel, in_specs, args, batch)

    return (h_new.reshape(SEQ_LEN, batch, HIDDEN_SIZ),
            c_new.reshape(SEQ_LEN, batch, HIDDEN_SIZ))


def init_hidden(batch):
    return jnp.zeros((SEQ_LEN, batch, HIDDEN_SIZ), jnp.float32)


# ----------------------------------------------------------------------------
# Parameters (shapes from Encoder.__init__), converted to kernel-ready layout:
# transposed (in, out) weights, bf16 big matrices, concatenated + gate-permuted
# LSTM weight, and the precomputed 4-row label table.
# ----------------------------------------------------------------------------
def _permute_gate_cols(m):
    """Columns [i|f|g|o] (each HIDDEN wide) -> NC chunks of [i|f|g|o] (each HC)."""
    r = m.shape[0]
    return m.reshape(r, 4, NC, HC).transpose(0, 2, 1, 3).reshape(r, 4 * HIDDEN_SIZ)


def make_params(seed=0):
    keys = jax.random.split(jax.random.PRNGKey(seed), 8)
    s = 0.05
    label_embedding = jax.random.normal(keys[0], (N_LABELS, COND_SIZ), jnp.float32) * s
    input_embedding = jax.random.normal(keys[1], (N_CLASSES, HIDDEN_SIZ), jnp.float32) * s
    fc_w_h = jax.random.normal(keys[2], (HIDDEN_SIZ, HIDDEN_SIZ), jnp.float32) * s
    fc_w_lab = jax.random.normal(keys[3], (COND_SIZ, HIDDEN_SIZ), jnp.float32) * s
    fc_b = jax.random.normal(keys[4], (1, HIDDEN_SIZ), jnp.float32) * s
    w_ih = jax.random.normal(keys[5], (HIDDEN_SIZ, 4 * HIDDEN_SIZ), jnp.float32) * s
    w_hh = jax.random.normal(keys[6], (HIDDEN_SIZ, 4 * HIDDEN_SIZ), jnp.float32) * s
    b_lstm = jax.random.normal(keys[7], (1, 4 * HIDDEN_SIZ), jnp.float32) * s  # == b_ih + b_hh

    # Offline fold of the label half of init_cond_fc (exact f32, matches torch
    # cat((hidden, label_emb)) column split).
    lab_table = label_embedding @ fc_w_lab + fc_b                  # (4, 512) f32
    w_cat = jnp.concatenate([w_ih, w_hh], axis=0)                  # (1024, 2048) i|f|g|o

    return {
        # kernel-ready tensors
        "input_embedding": input_embedding,                        # f32 (29, 512)
        "lab_table": lab_table,                                    # f32 (4, 512)
        "fc_w_h": fc_w_h.astype(jnp.bfloat16),                     # bf16 (512, 512)
        "w_cat": _permute_gate_cols(w_cat).astype(jnp.bfloat16),   # bf16 (1024, 2048)
        "b_cat": _permute_gate_cols(b_lstm),                       # f32 (1, 2048)
        # f32 originals kept for the reference checks
        "label_embedding": label_embedding, "fc_w_lab": fc_w_lab, "fc_b": fc_b,
        "fc_w_h_f32": fc_w_h, "w_ih": w_ih, "w_hh": w_hh, "b_lstm": b_lstm,
    }


# ----------------------------------------------------------------------------
# References
# ----------------------------------------------------------------------------
def _ref_cell(gates, c_prev):
    H = HIDDEN_SIZ
    i = jax.nn.sigmoid(gates[:, 0:H])
    f = jax.nn.sigmoid(gates[:, H:2 * H])
    g = jnp.tanh(gates[:, 2 * H:3 * H])
    o = jax.nn.sigmoid(gates[:, 3 * H:4 * H])
    c_new = f * c_prev + i * g
    return o * jnp.tanh(c_new), c_new


def reference_forward_mixed(params, x, hidden_state=None, cell_state=None, label=None):
    """Pure-JAX mirror of the kernel's bf16-weight / f32-accumulate arithmetic."""
    batch = x.shape[0]
    x_emb = params["input_embedding"][x]
    h = hidden_state.reshape(batch, HIDDEN_SIZ)
    if label is not None:
        h = (jnp.dot(h.astype(jnp.bfloat16), params["fc_w_h"],
                     preferred_element_type=jnp.float32)
             + params["lab_table"][label])
        c = h
    else:
        c = cell_state.reshape(batch, HIDDEN_SIZ)
    w_cat = jnp.concatenate([params["w_ih"], params["w_hh"]], axis=0).astype(jnp.bfloat16)
    xh = jnp.concatenate([x_emb, h], axis=1).astype(jnp.bfloat16)
    gates = jnp.dot(xh, w_cat, preferred_element_type=jnp.float32) + params["b_lstm"]
    h_new, c_new = _ref_cell(gates, c)
    return (h_new.reshape(SEQ_LEN, batch, HIDDEN_SIZ),
            c_new.reshape(SEQ_LEN, batch, HIDDEN_SIZ))


def reference_forward_f32(params, x, hidden_state=None, cell_state=None, label=None):
    """Full-f32 mirror of the original PyTorch module (bounds bf16 drift)."""
    batch = x.shape[0]
    x_emb = params["input_embedding"][x]
    h = hidden_state.reshape(batch, HIDDEN_SIZ)
    if label is not None:
        lab = params["label_embedding"][label]
        fc_w = jnp.concatenate([params["fc_w_h_f32"], params["fc_w_lab"]], axis=0)
        h = jnp.concatenate([h, lab], axis=1) @ fc_w + params["fc_b"]
        c = h
    else:
        c = cell_state.reshape(batch, HIDDEN_SIZ)
    gates = x_emb @ params["w_ih"] + h @ params["w_hh"] + params["b_lstm"]
    h_new, c_new = _ref_cell(gates, c)
    return (h_new.reshape(SEQ_LEN, batch, HIDDEN_SIZ),
            c_new.reshape(SEQ_LEN, batch, HIDDEN_SIZ))


# ----------------------------------------------------------------------------
if __name__ == "__main__":
    B = 4
    params = make_params(0)
    key = jax.random.PRNGKey(0)
    kx, kl = jax.random.split(key)
    x = jax.random.randint(kx, (B,), 0, N_CLASSES, dtype=jnp.int32)
    label = jax.random.randint(kl, (B,), 0, N_LABELS, dtype=jnp.int32)
    h0 = init_hidden(B)

    # Branch 1: label-conditioned hidden-state init
    h1, c1 = encoder_forward(params, x, hidden_state=h0, label=label)
    jax.block_until_ready((h1, c1))
    mh1, mc1 = reference_forward_mixed(params, x, hidden_state=h0, label=label)
    fh1, fc1_ = reference_forward_f32(params, x, hidden_state=h0, label=label)
    assert h1.shape == (SEQ_LEN, B, HIDDEN_SIZ) and c1.shape == (SEQ_LEN, B, HIDDEN_SIZ)
    np.testing.assert_allclose(np.asarray(h1), np.asarray(mh1), atol=5e-4, rtol=1e-3)
    np.testing.assert_allclose(np.asarray(c1), np.asarray(mc1), atol=5e-4, rtol=1e-3)
    np.testing.assert_allclose(np.asarray(h1), np.asarray(fh1), atol=3e-2, rtol=3e-2)
    np.testing.assert_allclose(np.asarray(c1), np.asarray(fc1_), atol=3e-2, rtol=3e-2)

    # Branch 2: plain LSTM step (no label), chained from branch 1
    h2, c2 = encoder_forward(params, x, hidden_state=h1, cell_state=c1)
    jax.block_until_ready((h2, c2))
    mh2, mc2 = reference_forward_mixed(params, x, hidden_state=mh1, cell_state=mc1)
    fh2, fc2_ = reference_forward_f32(params, x, hidden_state=fh1, cell_state=fc1_)
    np.testing.assert_allclose(np.asarray(h2), np.asarray(mh2), atol=5e-4, rtol=1e-3)
    np.testing.assert_allclose(np.asarray(c2), np.asarray(mc2), atol=5e-4, rtol=1e-3)
    np.testing.assert_allclose(np.asarray(h2), np.asarray(fh2), atol=5e-2, rtol=5e-2)
    np.testing.assert_allclose(np.asarray(c2), np.asarray(fc2_), atol=5e-2, rtol=5e-2)

    print("KERNEL_OK")
</pallas_src>

<mosaic_0001>
module attributes {stable_mosaic.version = 11 : i64} {
  func.func @_enc_label_kernel(%arg0: i32, %arg1: memref<4x1xi32, #tpu.memory_space<vmem>>, %arg2: memref<4x1xi32, #tpu.memory_space<vmem>>, %arg3: memref<4x512xf32, #tpu.memory_space<vmem>>, %arg4: memref<29x512xf32, #tpu.memory_space<vmem>>, %arg5: memref<4x512xf32, #tpu.memory_space<vmem>>, %arg6: memref<4x128xf32, #tpu.memory_space<vmem>>, %arg7: memref<512x512xbf16, #tpu.memory_space<vmem>>, %arg8: memref<512x128xbf16, #tpu.memory_space<vmem>>, %arg9: memref<1024x512xbf16, #tpu.memory_space<vmem>>, %arg10: memref<1x512xf32, #tpu.memory_space<vmem>>, %arg11: memref<4x128xf32, #tpu.memory_space<vmem>>, %arg12: memref<4x128xf32, #tpu.memory_space<vmem>>) attributes {dimension_semantics = [#tpu.dimension_semantics<parallel>], iteration_bounds = array<i64: 4>, scalar_prefetch = 0 : i64, scratch_operands = 0 : i64, tpu.core_type = #tpu.core_type<tc>, window_params = [{pipeline_mode = #tpu.pipeline_mode<synchronous>, transform_indices = @transform_0, window_bounds = array<i64: 4, 1>}, {pipeline_mode = #tpu.pipeline_mode<synchronous>, transform_indices = @transform_1, window_bounds = array<i64: 4, 1>}, {pipeline_mode = #tpu.pipeline_mode<synchronous>, transform_indices = @transform_2, window_bounds = array<i64: 4, 512>}, {pipeline_mode = #tpu.pipeline_mode<synchronous>, transform_indices = @transform_3, window_bounds = array<i64: 29, 512>}, {pipeline_mode = #tpu.pipeline_mode<synchronous>, transform_indices = @transform_4, window_bounds = array<i64: 4, 512>}, {transform_indices = @transform_5, window_bounds = array<i64: 4, 128>}, {pipeline_mode = #tpu.pipeline_mode<synchronous>, transform_indices = @transform_6, window_bounds = array<i64: 512, 512>}, {transform_indices = @transform_7, window_bounds = array<i64: 512, 128>}, {transform_indices = @transform_8, window_bounds = array<i64: 1024, 512>}, {transform_indices = @transform_9, window_bounds = array<i64: 1, 512>}, {transform_indices = @transform_10, window_bounds = array<i64: 4, 128>}, {transform_indices = @transform_11, window_bounds = array<i64: 4, 128>}]} {
    %c0 = arith.constant 0 : index
    %c0_0 = arith.constant 0 : index
    %0 = vector.load %arg1[%c0, %c0_0] : memref<4x1xi32, #tpu.memory_space<vmem>>, vector<4x1xi32>
    %1 = tpu.iota {dimensions = array<i32: 1>} : vector<4x29xi32>
    %2 = vector.broadcast %0 : vector<4x1xi32> to vector<4x29xi32>
    %3 = arith.cmpi eq, %1, %2 : vector<4x29xi32>
    %4 = arith.extui %3 : vector<4x29xi1> to vector<4x29xi32>
    %5 = arith.sitofp %4 : vector<4x29xi32> to vector<4x29xf32>
    %c0_1 = arith.constant 0 : index
    %c0_2 = arith.constant 0 : index
    %6 = vector.load %arg2[%c0_1, %c0_2] : memref<4x1xi32, #tpu.memory_space<vmem>>, vector<4x1xi32>
    %7 = tpu.iota {dimensions = array<i32: 1>} : vector<4x4xi32>
    %8 = vector.broadcast %6 : vector<4x1xi32> to vector<4x4xi32>
    %9 = arith.cmpi eq, %7, %8 : vector<4x4xi32>
    %10 = arith.extui %9 : vector<4x4xi1> to vector<4x4xi32>
    %11 = arith.sitofp %10 : vector<4x4xi32> to vector<4x4xf32>
    %c0_3 = arith.constant 0 : index
    %c0_4 = arith.constant 0 : index
    %12 = vector.load %arg4[%c0_3, %c0_4] : memref<29x512xf32, #tpu.memory_space<vmem>>, vector<29x512xf32>
    %cst = arith.constant dense<0.000000e+00> : vector<4x512xf32>
    %13 = tpu.matmul %5, %12, %cst {dimension_numbers = #tpu.dot_dimension_numbers<[1], [0], [0], [1], [0, 0, 1, 1], [], []>} : vector<4x29xf32>, vector<29x512xf32>, vector<4x512xf32> -> vector<4x512xf32>
    %c0_5 = arith.constant 0 : index
    %c0_6 = arith.constant 0 : index
    %14 = vector.load %arg3[%c0_5, %c0_6] : memref<4x512xf32, #tpu.memory_space<vmem>>, vector<4x512xf32>
    %15 = arith.truncf %14 : vector<4x512xf32> to vector<4x512xbf16>
    %c0_7 = arith.constant 0 : index
    %c0_8 = arith.constant 0 : index
    %16 = vector.load %arg7[%c0_7, %c0_8] : memref<512x512xbf16, #tpu.memory_space<vmem>>, vector<512x512xbf16>
    %cst_9 = arith.constant dense<0.000000e+00> : vector<4x512xf32>
    %17 = tpu.matmul %15, %16, %cst_9 {dimension_numbers = #tpu.dot_dimension_numbers<[1], [0], [0], [1], [0, 0, 1, 1], [], []>} : vector<4x512xbf16>, vector<512x512xbf16>, vector<4x512xf32> -> vector<4x512xf32>
    %c0_10 = arith.constant 0 : index
    %c0_11 = arith.constant 0 : index
    %18 = vector.load %arg5[%c0_10, %c0_11] : memref<4x512xf32, #tpu.memory_space<vmem>>, vector<4x512xf32>
    %cst_12 = arith.constant dense<0.000000e+00> : vector<4x512xf32>
    %19 = tpu.matmul %11, %18, %cst_12 {dimension_numbers = #tpu.dot_dimension_numbers<[1], [0], [0], [1], [0, 0, 1, 1], [], []>} : vector<4x4xf32>, vector<4x512xf32>, vector<4x512xf32> -> vector<4x512xf32>
    %20 = arith.addf %17, %19 : vector<4x512xf32>
    %c0_13 = arith.constant 0 : index
    %c0_14 = arith.constant 0 : index
    %21 = vector.load %arg8[%c0_13, %c0_14] : memref<512x128xbf16, #tpu.memory_space<vmem>>, vector<512x128xbf16>
    %cst_15 = arith.constant dense<0.000000e+00> : vector<4x128xf32>
    %22 = tpu.matmul %15, %21, %cst_15 {dimension_numbers = #tpu.dot_dimension_numbers<[1], [0], [0], [1], [0, 0, 1, 1], [], []>} : vector<4x512xbf16>, vector<512x128xbf16>, vector<4x128xf32> -> vector<4x128xf32>
    %c0_16 = arith.constant 0 : index
    %c0_17 = arith.constant 0 : index
    %23 = vector.load %arg6[%c0_16, %c0_17] : memref<4x128xf32, #tpu.memory_space<vmem>>, vector<4x128xf32>
    %cst_18 = arith.constant dense<0.000000e+00> : vector<4x128xf32>
    %24 = tpu.matmul %11, %23, %cst_18 {dimension_numbers = #tpu.dot_dimension_numbers<[1], [0], [0], [1], [0, 0, 1, 1], [], []>} : vector<4x4xf32>, vector<4x128xf32>, vector<4x128xf32> -> vector<4x128xf32>
    %25 = arith.addf %22, %24 : vector<4x128xf32>
    %26 = arith.truncf %13 : vector<4x512xf32> to vector<4x512xbf16>
    %27 = arith.truncf %20 : vector<4x512xf32> to vector<4x512xbf16>
    %28 = tpu.concatenate %26, %27 in 1 : vector<4x512xbf16>, vector<4x512xbf16> -> vector<4x1024xbf16>
    %c0_19 = arith.constant 0 : index
    %c0_20 = arith.constant 0 : index
    %29 = vector.load %arg9[%c0_19, %c0_20] : memref<1024x512xbf16, #tpu.memory_space<vmem>>, vector<1024x512xbf16>
    %cst_21 = arith.constant dense<0.000000e+00> : vector<4x512xf32>
    %30 = tpu.matmul %28, %29, %cst_21 {dimension_numbers = #tpu.dot_dimension_numbers<[1], [0], [0], [1], [0, 0, 1, 1], [], []>} : vector<4x1024xbf16>, vector<1024x512xbf16>, vector<4x512xf32> -> vector<4x512xf32>
    %c0_22 = arith.constant 0 : index
    %c0_23 = arith.constant 0 : index
    %31 = vector.load %arg10[%c0_22, %c0_23] : memref<1x512xf32, #tpu.memory_space<vmem>>, vector<1x512xf32>
    %32 = vector.broadcast %31 : vector<1x512xf32> to vector<4x512xf32>
    %33 = arith.addf %30, %32 : vector<4x512xf32>
    %34 = vector.extract_strided_slice %33 {offsets = [0, 0], sizes = [4, 128], strides = [1, 1]} : vector<4x512xf32> to vector<4x128xf32>
    %35 = arith.negf %34 : vector<4x128xf32>
    %36 = math.exp %35 : vector<4x128xf32>
    %cst_24 = arith.constant 1.000000e+00 : f32
    %37 = vector.broadcast %cst_24 : f32 to vector<4x128xf32>
    %38 = arith.addf %37, %36 : vector<4x128xf32>
    %39 = arith.divf %37, %38 : vector<4x128xf32>
    %40 = vector.extract_strided_slice %33 {offsets = [0, 128], sizes = [4, 128], strides = [1, 1]} : vector<4x512xf32> to vector<4x128xf32>
    %41 = arith.negf %40 : vector<4x128xf32>
    %42 = math.exp %41 : vector<4x128xf32>
    %cst_25 = arith.constant 1.000000e+00 : f32
    %43 = vector.broadcast %cst_25 : f32 to vector<4x128xf32>
    %44 = arith.addf %43, %42 : vector<4x128xf32>
    %45 = arith.divf %43, %44 : vector<4x128xf32>
    %46 = vector.extract_strided_slice %33 {offsets = [0, 256], sizes = [4, 128], strides = [1, 1]} : vector<4x512xf32> to vector<4x128xf32>
    %47 = math.tanh %46 : vector<4x128xf32>
    %48 = vector.extract_strided_slice %33 {offsets = [0, 384], sizes = [4, 128], strides = [1, 1]} : vector<4x512xf32> to vector<4x128xf32>
    %49 = arith.negf %48 : vector<4x128xf32>
    %50 = math.exp %49 : vector<4x128xf32>
    %cst_26 = arith.constant 1.000000e+00 : f32
    %51 = vector.broadcast %cst_26 : f32 to vector<4x128xf32>
    %52 = arith.addf %51, %50 : vector<4x128xf32>
    %53 = arith.divf %51, %52 : vector<4x128xf32>
    %54 = arith.mulf %45, %25 : vector<4x128xf32>
    %55 = arith.mulf %39, %47 : vector<4x128xf32>
    %56 = arith.addf %54, %55 : vector<4x128xf32>
    %57 = math.tanh %56 : vector<4x128xf32>
    %58 = arith.mulf %53, %57 : vector<4x128xf32>
    %c0_27 = arith.constant 0 : index
    %c0_28 = arith.constant 0 : index
    %59 = vector.load %arg11[%c0_27, %c0_28] : memref<4x128xf32, #tpu.memory_space<vmem>>, vector<4x128xf32>
    tpu.vector_store %arg11[%c0_27, %c0_28], %58 {strides = array<i32>} : memref<4x128xf32, #tpu.memory_space<vmem>>, vector<4x128xf32>,
    %c0_29 = arith.constant 0 : index
    %c0_30 = arith.constant 0 : index
    %60 = vector.load %arg12[%c0_29, %c0_30] : memref<4x128xf32, #tpu.memory_space<vmem>>, vector<4x128xf32>
    tpu.vector_store %arg12[%c0_29, %c0_30], %56 {strides = array<i32>} : memref<4x128xf32, #tpu.memory_space<vmem>>, vector<4x128xf32>,
    return
  }
  func.func @transform_0(%arg0: i32) -> (i32, i32) {
    %c0_i32 = arith.constant 0 : i32
    %c0_i32_0 = arith.constant 0 : i32
    %c0_i32_1 = arith.constant 0 : i32
    return %c0_i32, %c0_i32_0 : i32, i32
  }
  func.func @transform_1(%arg0: i32) -> (i32, i32) {
    %c0_i32 = arith.constant 0 : i32
    %c0_i32_0 = arith.constant 0 : i32
    %c0_i32_1 = arith.constant 0 : i32
    return %c0_i32, %c0_i32_0 : i32, i32
  }
  func.func @transform_2(%arg0: i32) -> (i32, i32) {
    %c0_i32 = arith.constant 0 : i32
    %c0_i32_0 = arith.constant 0 : i32
    %c0_i32_1 = arith.constant 0 : i32
    return %c0_i32, %c0_i32_0 : i32, i32
  }
  func.func @transform_3(%arg0: i32) -> (i32, i32) {
    %c0_i32 = arith.constant 0 : i32
    %c0_i32_0 = arith.constant 0 : i32
    %c0_i32_1 = arith.constant 0 : i32
    return %c0_i32, %c0_i32_0 : i32, i32
  }
  func.func @transform_4(%arg0: i32) -> (i32, i32) {
    %c0_i32 = arith.constant 0 : i32
    %c0_i32_0 = arith.constant 0 : i32
    %c0_i32_1 = arith.constant 0 : i32
    return %c0_i32, %c0_i32_0 : i32, i32
  }
  func.func @transform_5(%arg0: i32) -> (i32, i32) {
    %c0_i32 = arith.constant 0 : i32
    %c0_i32_0 = arith.constant 0 : i32
    return %c0_i32, %arg0 : i32, i32
  }
  func.func @transform_6(%arg0: i32) -> (i32, i32) {
    %c0_i32 = arith.constant 0 : i32
    %c0_i32_0 = arith.constant 0 : i32
    %c0_i32_1 = arith.constant 0 : i32
    return %c0_i32, %c0_i32_0 : i32, i32
  }
  func.func @transform_7(%arg0: i32) -> (i32, i32) {
    %c0_i32 = arith.constant 0 : i32
    %c0_i32_0 = arith.constant 0 : i32
    return %c0_i32, %arg0 : i32, i32
  }
  func.func @transform_8(%arg0: i32) -> (i32, i32) {
    %c0_i32 = arith.constant 0 : i32
    %c0_i32_0 = arith.constant 0 : i32
    return %c0_i32, %arg0 : i32, i32
  }
  func.func @transform_9(%arg0: i32) -> (i32, i32) {
    %c0_i32 = arith.constant 0 : i32
    %c0_i32_0 = arith.constant 0 : i32
    return %c0_i32, %arg0 : i32, i32
  }
  func.func @transform_10(%arg0: i32) -> (i32, i32) {
    %c0_i32 = arith.constant 0 : i32
    %c0_i32_0 = arith.constant 0 : i32
    return %c0_i32, %arg0 : i32, i32
  }
  func.func @transform_11(%arg0: i32) -> (i32, i32) {
    %c0_i32 = arith.constant 0 : i32
    %c0_i32_0 = arith.constant 0 : i32
    return %c0_i32, %arg0 : i32, i32
  }
}

</mosaic_0001>

<bundles_post_ra>
// kernel: encoder_forward.1
= control target key start
LH: loop header
LB: loop body
LE: loop exit
PB: predicated region body
PF: predicated region fallthrough
CT: control target
= control target key end

     0   :  { %s7024_s0 = inlined_call_operand.vmem [shape: s32[4,1], index: 0, kind: input, shape index: {}]   ;;  %s7025_s1 = inlined_call_operand.vmem [shape: s32[4,1], index: 1, kind: input, shape index: {}]   ;;  %s7026_s2 = inlined_call_operand.hbm [shape: f32[4,512], index: 2, kind: input, shape index: {}]   ;;  %s7027_s3 = inlined_call_operand.hbm [shape: f32[29,512], index: 3, kind: input, shape index: {}]   ;;  %s7028_s4 = inlined_call_operand.hbm [shape: f32[4,512], index: 4, kind: input, shape index: {}, may-alias: {4,5}]   ;;  %s7029_s5 = inlined_call_operand.hbm [shape: f32[4,512], index: 5, kind: input, shape index: {}, may-alias: {4,5}]   ;;  %s7030_s6 = inlined_call_operand.hbm [shape: bf16[512,512], index: 6, kind: input, shape index: {}, may-alias: {6,7}]   ;;  %s7031_s7 = inlined_call_operand.hbm [shape: bf16[512,512], index: 7, kind: input, shape index: {}, may-alias: {6,7}]   ;;  %s7032_s8 = inlined_call_operand.hbm [shape: bf16[1024,2048], index: 8, kind: input, shape index: {}]   ;;  %s7033_s9 = inlined_call_operand.hbm [shape: f32[1,2048], index: 9, kind: input, shape index: {}]   ;;  %s7034_s10 = inlined_call_operand.hbm [shape: f32[4,512], index: 10, kind: output, shape index: {0}]   ;;  %s7035_s11 = inlined_call_operand.hbm [shape: f32[4,512], index: 11, kind: output, shape index: {1}]  }
   0x1   :  { %7062 = sst [smem:[#allocation34_spill]] %s7024_s0 }
   0x2   :  { %7063 = sst [smem:[#allocation35_spill]] %s7025_s1 }
   0x3   :  { %7064 = sst [smem:[#allocation36_spill]] %s7027_s3 }
   0x4   :  { %7065 = sst [smem:[#allocation37_spill]] %s7030_s6 }
   0x5   :  { %7066 = sst [smem:[#allocation38_spill]] %s7031_s7 }
   0x6   :  { %7067 = sst [smem:[#allocation39_spill]] %s7034_s10 }
   0x7   :  { %7068 = sst [smem:[#allocation40_spill]] %s7035_s11 }
   0x8   :  { %17 = vsyncpa [#allocation3], 0 }
   0x9   :  { %18 = vsyncpa [#allocation6], 0 }
   0xa   :  { %19 = vsyncpa [#allocation9], 0 }
   0xb   :  { %21 = vsyncpa [#allocation9 + $0x1], 0 }
   0xc   :  { %22 = vsyncpa [#allocation12], 0 }
   0xd   :  { %24 = vsyncpa [#allocation12 + $0x1], 0 }
   0xe   :  { %25 = vsyncpa [#allocation15], 0 }
   0xf   :  { %27 = vsyncpa [#allocation15 + $0x1], 0 }
  0x10   :  { %28 = vsyncpa [#allocation4], 0 }
  0x11   :  { %30 = vsyncpa [#allocation4 + $0x1], 0 }
  0x12   :  { %31 = vsyncpa [#allocation18], 0 }
  0x13   :  { %33 = vsyncpa [#allocation18 + $0x1], 0  ;;  %s6200_s17 = smov 0   ;;  %s6202_s18 = smov 0  }
  0x14   :  { %s6204_s19 = smov 0   ;;  %s6206_s20 = smov 0  }
  0x15 LB: > { %7069 = sst [smem:[#allocation27_spill]] %s6105_s17  ;;  %s6221_s21 = sadd.s32 4294967295, %s6117_s20   ;;  %s6117_s20 = sphi %s6206_s20, %s7116_s20   ;;  %s6113_s19 = sphi %s6204_s19, %s7118_s19   ;;  %s6109_s18 = sphi %s6202_s18, %s7120_s18   ;;  %s6105_s17 = sphi %s6200_s17, %s7119_s17  }
  0x16   : > { %7070 = sst [smem:[#allocation28_spill]] %s6113_s19  ;;  %s4450_s22 = sadd.s32 4294967294, %s6117_s20  }
  0x17   : > { %s6225_s23 = sadd.s32 1, %s6117_s20   ;;  %s151_s24 = sadd.s32 1, %s6113_s19 }
  0x18   : > { %7071 = sst [smem:[#allocation29_spill]] %s6225_s23  ;;  %s148_s25 = ssub.s32 %s6117_s20, %s6225_s23 }
  0x19   : > { %p158_p0 = scmp.ne.s32.totalorder %s6113_s19, %s6109_s18  ;;  %p149_p1 = scmp.eq.s32.totalorder %s148_s25, 0 }
  0x1a   : > { %p159_p2 = scmp.eq.s32.totalorder %s6117_s20, 0  ;;  %p164_p3 = scmp.ne.s32.totalorder %s6109_s18, %s6105_s17 }
  0x1b   : > { %p7041_p4 = scmp.eq.s32.totalorder %s6221_s21, 0  ;;  %p287_p7 = scmp.eq.s32.totalorder %s6221_s21, 3 }
  0x1c   : > { %s6237_s26 = scalar_select %p149_p1, %s6113_s19, %s151_s24  }
  0x1d   : > { %p6239_p5 = por %p159_p2, %p158_p0  ;;  %p6245_p6 = por %p7041_p4, %p164_p3 }
  0x1e   : > { %7072 = sst [smem:[#allocation30_spill]] %s6237_s26  ;;  %p293_p8 = scmp.eq.s32.totalorder %s4450_s22, 3 }
  0x1f   : > { %s7073_s27 = scalar_select %p6239_p5, 1, 0 }
  0x20   : > { %s7074_s28 = scalar_select %p6245_p6, 1, 0 }
  0x21   : > { %p4451_p9 = scmp.ge.s32.totalorder %s6117_s20, 1  ;;  %p326_p10 = scmp.lt.s32.totalorder %s6117_s20, 5 }
  0x22   : > { %7075 = sst [smem:[#allocation31_spill]] %s7074_s28  ;;  %p6252_p11 = por %p287_p7, %p158_p0 }
  0x23   : > { %p6256_p12 = por %p293_p8, %p164_p3  ;;  %p6260_p13 = pnand %p4451_p9, %p326_p10 }
  0x24   : > { %s7076_s29 = scalar_select %p6252_p11, 1, 0 }
  0x25   : > { %s7078_s30 = scalar_select %p6256_p12, 1, 0 }
  0x26   : > { %7077 = sst [smem:[#allocation32_spill]] %s7076_s29  ;;  %p5048_p1 = pneg %p6260_p13 }
  0x27   : > { %7079 = sst [smem:[#allocation33_spill]] %s7078_s30  ;;  %s6119_s13 = smov [#allocation5]  }
  0x28   : > { %s7080_s12 = scalar_select %p6260_p13, 1, 0 }
  0x29   : > { %s355_s14 = sshll.u32 %s6119_s13, 4  ;;  %p6268_p2 = pnand %p5048_p1, %p7041_p4  ;;  %s356_s14 = int_to_ptr.vmem [resolvable:$true] %s355_s14 }
  0x2a   : > { %s6120_s16 = smov [#allocation10]   ;;  %s7082_s3 = sld [smem:[#allocation36_spill]] }
  0x2b   : > { %s7081_s15 = scalar_select %p6268_p2, 1, 0 }
  0x2c   : > { %s379_s22 = sshll.u32 %s6120_s16, 4  ;;  %p6280_p3 = pneg %p6268_p2  ;;  %s380_s22 = int_to_ptr.vmem [resolvable:$true] %s379_s22 }
  0x2e   : > { %s7083_s13 = scalar_select %p6280_p3, 1, 0 }
  0x30   : > { %s5767_s26 = scalar_lea.hbm %s7082_s3, 2048 }
  0x31   : > { %p5768_p0 = scmp.ne.s32.totalorder %s7082_s3, %s5767_s26  ;;  %p5774_p9 = scmp.lt.u32.totalorder %s5767_s26, %s7082_s3 }
  0x33   : > { %p5770_p7 = pnand %p6280_p3, %p5768_p0 }
  0x35   : > { %p5771_p8 = pneg %p5770_p7 }
  0x37   : > { %p5776_p10 = pnand %p5774_p9, %p5771_p8 }
  0x39   : > { %5779 = shalt.err (!%p5776_p10)
}
  0x3a   : > { %s5780_s16 = scalar_lea.vmem %s356_s14, 2048  ;;  %p5788_p11 = scmp.lt.s32.totalorder %s356_s14, %s356_s14 }
  0x3b   : > { %p5781_p1 = scmp.ne.s32.totalorder %s356_s14, %s5780_s16  ;;  %p5789_p6 = scmp.lt.s32.totalorder %s5780_s16, %s5780_s16 }
  0x3d   : > { %p5783_p4 = pnand %p5781_p1, %p6280_p3  ;;  %p5790_p13 = por %p5789_p6, %p5788_p11 }
  0x3f   : > { %p5784_p12 = pneg %p5783_p4 }
  0x41   : > { %p5791_p5 = pnand %p5790_p13, %p5784_p12 }
  0x43   : > { %5794 = shalt.err (!%p5791_p5)
}
  0x44   : > { %s6121_s23 = smov 512   ;;  %s6122_s30 = smov 32  }
  0x45   : > { %5054 = dma.hbm_to_vmem [thread:$0]  (!%p6268_p2), %s7082_s3, 2048, %s356_s14, [#allocation6], %s6121_s23, %s6121_s23, %s6122_s30  }
  0x46   : > { %s7084_s6 = sld [smem:[#allocation37_spill]] }
  0x4c   : > { %s5795_s25 = scalar_lea.hbm %s7084_s6, 16384 }
  0x4d   : > { %p5796_p4 = scmp.ne.s32.totalorder %s7084_s6, %s5795_s25  ;;  %p5802_p11 = scmp.lt.u32.totalorder %s5795_s25, %s7084_s6 }
  0x4f   : > { %p5798_p5 = pnand %p5796_p4, %p6280_p3 }
  0x51   : > { %p5799_p6 = pneg %p5798_p5 }
  0x53   : > { %p5804_p12 = pnand %p5802_p11, %p5799_p6 }
  0x55   : > { %5807 = shalt.err (!%p5804_p12)
}
  0x56   : > { %s5808_s10 = scalar_lea.vmem %s380_s22, 16384  ;;  %p5816_p8 = scmp.lt.s32.totalorder %s380_s22, %s380_s22 }
  0x57   : > { %p5809_p13 = scmp.ne.s32.totalorder %s380_s22, %s5808_s10  ;;  %p5817_p9 = scmp.lt.s32.totalorder %s5808_s10, %s5808_s10 }
  0x59   : > { %p5811_p0 = pnand %p5809_p13, %p6280_p3  ;;  %p5818_p10 = por %p5817_p9, %p5816_p8 }
  0x5b   : > { %p5812_p7 = pneg %p5811_p0 }
  0x5d   : > { %p5819_p1 = pnand %p5818_p10, %p5812_p7 }
  0x5f   : > { %5822 = shalt.err (!%p5819_p1)
}
  0x60   : > { %s7049_s11 = smov 256   ;;  %s7048_s1 = smov 16  }
  0x61   : > { %5060 = dma.hbm_to_vmem [thread:$0]  (!%p6268_p2), %s7084_s6, 16384, %s380_s22, [#allocation9], %s7049_s11, %s7049_s11, %s7048_s1  }
  0x62   : > { %p5085_p4 = scmp.lt.s32.totalorder %s6117_s20, 4  ;;  %s7051_s23 = sand.u32 1, %s6117_s20  }
  0x63   : > { %s6320_s30 = sand.u32 1, %s6113_s19   ;;  %s6323_s17 = sshll.u32 %s6117_s20, 6 }
  0x64   : > { %p7085_p5 = scmp.ne.s32.totalorder %s7073_s27, 0  ;;  %s4459_s24 = sshll.u32 %s6320_s30, 8 }
  0x65   : > { %s7087_s7 = sld [smem:[#allocation38_spill]]  ;;  %s415_s22 = scalar_lea.vmem [#allocation11], %s4459_s24 }
  0x66   : > { %p6327_p6 = pnand %p5085_p4, %p7085_p5  ;;  %s421_s29 = sshll.u32 %s415_s22, 4  ;;  %s6338_s29 = int_to_ptr.vmem [resolvable:$true] %s421_s29 }
  0x67   : > { %s6342_s27 = scalar_lea.sflag [#allocation12], %s7051_s23 }
  0x68   : > { %s7086_s26 = scalar_select %p6327_p6, 1, 0 }
  0x69   : > { %p6348_p12 = pneg %p6327_p6 }
  0x6b   : > { %s6336_s10 = scalar_lea.hbm %s7087_s7, %s6323_s17  ;;  %s5828_s24 = scalar_lea.hbm %s7087_s7, 16384 }
  0x6c   : > { %s5823_s14 = scalar_lea.hbm %s6336_s10, 4096  ;;  %p5829_p7 = scmp.lt.u32.totalorder %s6336_s10, %s7087_s7 }
  0x6d   : > { %p5824_p11 = scmp.ne.s32.totalorder %s6336_s10, %s5823_s14  ;;  %p5830_p8 = scmp.lt.u32.totalorder %s5828_s24, %s5823_s14 }
  0x6e   : > { %p5832_p10 = scmp.lt.u32.totalorder %s5823_s14, %s6336_s10 }
  0x6f   : > { %p5826_p13 = pnand %p6348_p12, %p5824_p11  ;;  %p5831_p9 = por %p5830_p8, %p5829_p7 }
  0x71   : > { %p5827_p0 = pneg %p5826_p13  ;;  %p5833_p1 = por %p5832_p10, %p5831_p9 }
  0x73   : > { %p5834_p4 = pnand %p5833_p1, %p5827_p0 }
  0x75   : > { %5837 = shalt.err (!%p5834_p4)
}
  0x76   : > { %s5838_s23 = scalar_lea.vmem %s6338_s29, 4096  ;;  %s6125_s25 = smov [#allocation11]  }
  0x77   : > { %p5839_p5 = scmp.ne.s32.totalorder %s6338_s29, %s5838_s23  ;;  %s5843_s16 = sshll.u32 %s6125_s25, 4  ;;  %s5844_s16 = int_to_ptr.vmem [resolvable:$false] %s5843_s16 }
  0x78   : > { %s5845_s11 = scalar_lea.vmem %s5844_s16, 8192  ;;  %p5846_p2 = scmp.lt.s32.totalorder %s6338_s29, %s5844_s16 }
  0x79   : > { %p5841_p11 = pnand %p5839_p5, %p6348_p12  ;;  %p5847_p3 = scmp.lt.s32.totalorder %s5845_s11, %s5838_s23 }
  0x7b   : > { %p5842_p13 = pneg %p5841_p11  ;;  %p5848_p7 = por %p5847_p3, %p5846_p2 }
  0x7d   : > { %p5849_p8 = pnand %p5848_p7, %p5842_p13 }
  0x7f   : > { %5852 = shalt.err (!%p5849_p8)
}
  0x80   : > { %s6126_s14 = smov 64   ;;  %s6127_s24 = smov 4  }
  0x81   : > { %s7089_s22 = smov 256   ;;  %s6128_s3 = smov [#allocation2]  }
  0x82   : > { %5067 = dma.hbm_to_vmem [thread:$0]  (!%p6327_p6), %s6336_s10, 4096, %s6338_s29, %s6342_s27, %s7089_s22, %s6126_s14, %s6127_s24  }
  0x83   : > { %s345_s6 = sshll.u32 %s6128_s3, 4  ;;  %s6129_s25 = smov [#allocation7]   ;;  %s346_s6 = int_to_ptr.vmem [resolvable:$true] %s345_s6 }
  0x84   : > { %s369_s7 = sshll.u32 %s6129_s25, 4  ;;  %s5853_s11 = scalar_lea.hbm %s7026_s2, 256  ;;  %s6373_s7 = int_to_ptr.vmem [resolvable:$true] %s369_s7 }
  0x85   : > { %p5854_p2 = scmp.ne.s32.totalorder %s7026_s2, %s5853_s11  ;;  %p7090_p3 = scmp.ne.s32.totalorder %s7083_s13, 0 }
  0x86   : > { %p5860_p10 = scmp.lt.u32.totalorder %s5853_s11, %s7026_s2 }
  0x87   : > { %p5856_p0 = pnand %p5854_p2, %p7090_p3 }
  0x89   : > { %p5857_p9 = pneg %p5856_p0 }
  0x8b   : > { %p5862_p1 = pnand %p5860_p10, %p5857_p9 }
  0x8d   : > { %5865 = shalt.err (!%p5862_p1)
}
  0x8e   : > { %s5866_s3 = scalar_lea.vmem %s346_s6, 256  ;;  %p5874_p13 = scmp.lt.s32.totalorder %s346_s6, %s346_s6 }
  0x8f   : > { %p5867_p4 = scmp.ne.s32.totalorder %s346_s6, %s5866_s3  ;;  %p5875_p7 = scmp.lt.s32.totalorder %s5866_s3, %s5866_s3 }
  0x91   : > { %p5869_p5 = pnand %p5867_p4, %p7090_p3  ;;  %p5876_p8 = por %p5875_p7, %p5874_p13 }
  0x93   : > { %p5870_p11 = pneg %p5869_p5 }
  0x95   : > { %p5877_p6 = pnand %p5876_p8, %p5870_p11 }
  0x97   : > { %5880 = shalt.err (!%p5877_p6)
}
  0x98   : > { %p7091_p2 = scmp.ne.s32.totalorder %s7081_s15, 0  ;;  %s5881_s14 = scalar_lea.hbm %s7028_s4, 256 }
  0x99   : > { %p5882_p0 = scmp.ne.s32.totalorder %s7028_s4, %s5881_s14  ;;  %p5888_p6 = scmp.lt.u32.totalorder %s5881_s14, %s7028_s4 }
  0x9a   : > { %5051 = dma.hbm_to_vmem [thread:$0]  (!%p7091_p2), %s7026_s2, 256, %s346_s6, [#allocation3]  }
  0x9b   : > { %p5884_p9 = pnand %p5882_p0, %p7090_p3 }
  0x9d   : > { %p5885_p10 = pneg %p5884_p9 }
  0x9f   : > { %p5890_p1 = pnand %p5888_p6, %p5885_p10 }
  0xa1   : > { %5893 = shalt.err (!%p5890_p1)
}
  0xa2   : > { %s5894_s6 = scalar_lea.vmem %s6373_s7, 256  ;;  %p5902_p13 = scmp.lt.s32.totalorder %s6373_s7, %s6373_s7 }
  0xa3   : > { %p5895_p4 = scmp.ne.s32.totalorder %s6373_s7, %s5894_s6  ;;  %p5903_p7 = scmp.lt.s32.totalorder %s5894_s6, %s5894_s6 }
  0xa5   : > { %p5897_p5 = pnand %p5895_p4, %p7090_p3  ;;  %p5904_p8 = por %p5903_p7, %p5902_p13 }
  0xa7   : > { %p5898_p11 = pneg %p5897_p5 }
  0xa9   : > { %p5905_p0 = pnand %p5904_p8, %p5898_p11 }
  0xab   : > { %5908 = shalt.err (!%p5905_p0)
}
  0xac   : > { %5057 = dma.hbm_to_vmem [thread:$0]  (!%p7091_p2), %s7028_s4, 256, %s6373_s7, [#allocation6]  }
  0xad   : > { %s4457_s13 = sshll.u32 %s6320_s30, 2  ;;  %s6421_s19 = scalar_lea.hbm %s7029_s5, %s6323_s17 }
  0xae   : > { %s397_s15 = scalar_lea.vmem [#allocation8], %s4457_s13  ;;  %s4461_s29 = sshll.u32 %s6320_s30, 11 }
  0xaf   : > { %s404_s28 = sshll.u32 %s397_s15, 4  ;;  %s7092_s14 = sand.u32 1, %s6117_s20   ;;  %s405_s28 = int_to_ptr.vmem [resolvable:$true] %s404_s28 }
  0xb0   : > { %s394_s24 = scalar_lea.sflag [#allocation9], %s7092_s14  ;;  %s5909_s25 = scalar_lea.hbm %s6421_s19, 64 }
  0xb1   : > { %p5910_p3 = scmp.ne.s32.totalorder %s6421_s19, %s5909_s25  ;;  %s5914_s16 = scalar_lea.hbm %s7029_s5, 256 }
  0xb2   : > { %p5915_p10 = scmp.lt.u32.totalorder %s6421_s19, %s7029_s5  ;;  %p5916_p6 = scmp.lt.u32.totalorder %s5914_s16, %s5909_s25 }
  0xb3   : > { %p5912_p2 = pnand %p5910_p3, %p6348_p12  ;;  %p5918_p4 = scmp.lt.u32.totalorder %s5909_s25, %s6421_s19 }
  0xb4   : > { %p5917_p1 = por %p5916_p6, %p5915_p10 }
  0xb5   : > { %p5913_p9 = pneg %p5912_p2 }
  0xb6   : > { %p5919_p5 = por %p5918_p4, %p5917_p1 }
  0xb8   : > { %p5920_p11 = pnand %p5919_p5, %p5913_p9 }
  0xba   : > { %5923 = shalt.err (!%p5920_p11)
}
  0xbb   : > { %s5924_s10 = scalar_lea.vmem %s405_s28, 64  ;;  %s6130_s3 = smov [#allocation8]  }
  0xbc   : > { %p5925_p13 = scmp.ne.s32.totalorder %s405_s28, %s5924_s10  ;;  %s5929_s0 = sshll.u32 %s6130_s3, 4  ;;  %s5930_s0 = int_to_ptr.vmem [resolvable:$false] %s5929_s0 }
  0xbd   : > { %s5931_s15 = scalar_lea.vmem %s5930_s0, 128  ;;  %p5932_p0 = scmp.lt.s32.totalorder %s405_s28, %s5930_s0 }
  0xbe   : > { %p5927_p7 = pnand %p5925_p13, %p6348_p12  ;;  %p5933_p3 = scmp.lt.s32.totalorder %s5931_s15, %s5924_s10 }
  0xc0   : > { %p5928_p8 = pneg %p5927_p7  ;;  %p5934_p2 = por %p5933_p3, %p5932_p0 }
  0xc2   : > { %p5935_p6 = pnand %p5934_p2, %p5928_p8 }
  0xc4   : > { %5938 = shalt.err (!%p5935_p6)
}
  0xc5   : > { %p7093_p10 = scmp.ne.s32.totalorder %s7086_s26, 0  ;;  %s4919_s14 = sshll.u32 %s6117_s20, 8 }
  0xc6   : > { %s435_s25 = scalar_lea.vmem [#allocation13], %s4461_s29  ;;  %s6451_s6 = scalar_lea.hbm %s7032_s8, %s4919_s14 }
  0xc7   : > { %5064 = dma.hbm_to_vmem [thread:$0]  (!%p7093_p10), %s6421_s19, 64, %s405_s28, %s394_s24  }
  0xc8   : > { %s442_s7 = sshll.u32 %s435_s25, 4  ;;  %s5939_s11 = scalar_lea.hbm %s6451_s6, 32768  ;;  %s6453_s7 = int_to_ptr.vmem [resolvable:$true] %s442_s7 }
  0xc9   : > { %p5940_p9 = scmp.ne.s32.totalorder %s6451_s6, %s5939_s11  ;;  %s5944_s29 = scalar_lea.hbm %s7032_s8, 131072 }
  0xca   : > { %p5945_p5 = scmp.lt.u32.totalorder %s6451_s6, %s7032_s8  ;;  %p5946_p11 = scmp.lt.u32.totalorder %s5944_s29, %s5939_s11 }
  0xcb   : > { %p5942_p1 = pnand %p5940_p9, %p6348_p12  ;;  %p5948_p7 = scmp.lt.u32.totalorder %s5939_s11, %s6451_s6 }
  0xcc   : > { %p5947_p13 = por %p5946_p11, %p5945_p5 }
  0xcd   : > { %p5943_p4 = pneg %p5942_p1 }
  0xce   : > { %p5949_p8 = por %p5948_p7, %p5947_p13 }
  0xd0   : > { %p5950_p0 = pnand %p5949_p8, %p5943_p4 }
  0xd2   : > { %5953 = shalt.err (!%p5950_p0)
}
  0xd3   : > { %s5954_s3 = scalar_lea.vmem %s6453_s7, 32768  ;;  %s6131_s0 = smov [#allocation13]  }
  0xd4   : > { %p5955_p3 = scmp.ne.s32.totalorder %s6453_s7, %s5954_s3  ;;  %s5959_s15 = sshll.u32 %s6131_s0, 4  ;;  %s5960_s15 = int_to_ptr.vmem [resolvable:$false] %s5959_s15 }
  0xd5   : > { %s5961_s14 = scalar_lea.vmem %s5960_s15, 65536  ;;  %p5962_p9 = scmp.lt.s32.totalorder %s6453_s7, %s5960_s15 }
  0xd6   : > { %p5957_p2 = pnand %p5955_p3, %p6348_p12  ;;  %p5963_p1 = scmp.lt.s32.totalorder %s5961_s14, %s5954_s3 }
  0xd8   : > { %p5958_p6 = pneg %p5957_p2  ;;  %p5964_p5 = por %p5963_p1, %p5962_p9 }
  0xda   : > { %p5965_p11 = pnand %p5964_p5, %p5958_p6 }
  0xdc   : > { %5968 = shalt.err (!%p5965_p11)
}
  0xdd   : > { %s6132_s25 = smov 1024   ;;  %s7094_s23 = smov 16  }
  0xde   : > { %5070 = dma.hbm_to_vmem [thread:$0]  (!%p7093_p10), %s6451_s6, 32768, %s6453_s7, %s6342_s27, %s6132_s25, %s7089_s22, %s7094_s23  }
  0xdf   : > { %s6483_s19 = scalar_lea.hbm %s7033_s9, %s6323_s17  ;;  %s456_s28 = scalar_lea.vmem [#allocation14], %s4457_s13 }
  0xe0   : > { %s464_s29 = sshll.u32 %s456_s28, 4  ;;  %s453_s24 = scalar_lea.sflag [#allocation15], %s6320_s30  ;;  %s465_s29 = int_to_ptr.vmem [resolvable:$true] %s464_s29 }
  0xe1   : > { %s5969_s10 = scalar_lea.hbm %s6483_s19, 64  ;;  %s5974_s7 = scalar_lea.hbm %s7033_s9, 256 }
  0xe2   : > { %p5970_p4 = scmp.ne.s32.totalorder %s6483_s19, %s5969_s10  ;;  %p5975_p8 = scmp.lt.u32.totalorder %s6483_s19, %s7033_s9 }
  0xe3   : > { %p5976_p0 = scmp.lt.u32.totalorder %s5974_s7, %s5969_s10  ;;  %p5978_p2 = scmp.lt.u32.totalorder %s5969_s10, %s6483_s19 }
  0xe4   : > { %p5972_p13 = pnand %p5970_p4, %p6348_p12 }
  0xe5   : > { %p5977_p3 = por %p5976_p0, %p5975_p8 }
  0xe6   : > { %p5973_p7 = pneg %p5972_p13 }
  0xe7   : > { %p5979_p6 = por %p5978_p2, %p5977_p3 }
  0xe9   : > { %p5980_p9 = pnand %p5979_p6, %p5973_p7 }
  0xeb   : > { %5983 = shalt.err (!%p5980_p9)
}
  0xec   : > { %s5984_s30 = scalar_lea.vmem %s465_s29, 64  ;;  %s6133_s13 = smov [#allocation14]  }
  0xed   : > { %p5985_p1 = scmp.ne.s32.totalorder %s465_s29, %s5984_s30  ;;  %s5989_s3 = sshll.u32 %s6133_s13, 4  ;;  %s5990_s3 = int_to_ptr.vmem [resolvable:$false] %s5989_s3 }
  0xee   : > { %s5991_s0 = scalar_lea.vmem %s5990_s3, 128  ;;  %p5992_p4 = scmp.lt.s32.totalorder %s465_s29, %s5990_s3 }
  0xef   : > { %p5987_p5 = pnand %p5985_p1, %p6348_p12  ;;  %p5993_p13 = scmp.lt.s32.totalorder %s5991_s0, %s5984_s30 }
  0xf1   : > { %p5988_p11 = pneg %p5987_p5  ;;  %p5994_p10 = por %p5993_p13, %p5992_p4 }
  0xf3   : > { %p5995_p0 = pnand %p5994_p10, %p5988_p11 }
  0xf5   : > { %5998 = shalt.err (!%p5995_p0)
}
  0xf6   : > { %p7095_p8 = scmp.ne.s32.totalorder %s7086_s26, 0  ;;  %p7096_p7 = scmp.ne.s32.totalorder %s7080_s12, 0 }
  0xf7   : > { %p7097_p3 = scmp.eq.s32.totalorder (!%p7096_p7), %s6221_s21, 0 }
  0xf8   : > { %5073 = dma.hbm_to_vmem [thread:$0]  (!%p7095_p8), %s6483_s19, 64, %s465_s29, %s453_s24  }
  0xf9   : > { %473 = sbr.rel (%p7096_p7) target bundleno = 1123 (0x463), region = 60 }
 0x100   : > { %6072 = dma.done.wait (%p7097_p3), [#allocation3], 256   ;;  %p7098_p12 = pmov %p7097_p3 }
 0x101   : > { %p7099_p2 = pmov %p7097_p3 }
 0x102   : > { %6074 = vsyncadd (%p7098_p12), [#allocation3], 4294967040 }
 0x103   : > { %6076 = dma.done.wait (%p7099_p2), [#allocation6], 2304   ;;  %p7100_p6 = pmov %p7099_p2 }
 0x104   : > { %s7101_s1 = sld [smem:[#allocation31_spill]]  ;;  %s487_s26 = sand.u32 1, %s6221_s21  }
 0x105   : > { %6078 = vsyncadd (%p7100_p6), [#allocation6], 4294964992  ;;  %s6517_s15 = sand.u32 1, %s6109_s18   ;;  %s488_s14 = scalar_lea.sflag [#allocation9], %s487_s26 }
 0x106   : > { %s6520_s12 = sshll.u32 %s6517_s15, 2 }
 0x107   : > { %s491_s25 = scalar_lea.vmem [#allocation8], %s6520_s12 }
 0x10a   : > { %p7102_p10 = scmp.ne.s32.totalorder %s7101_s1, 0 }
 0x10c   : > { %6080 = dma.done.wait (%p7102_p10), %s488_s14, 64  }
 0x10d   : > { %6082 = vsyncadd (%p7102_p10), %s488_s14, 4294967232  ;;  %p7103_p9 = pmov %p7099_p2 }
 0x10e   : > { %p7104_p1 = pmov %p7099_p2 }
 0x10f   : > { %6084 = dma.done.wait (%p7103_p9), [#allocation9], 16384  }
 0x110   : > { %6086 = vsyncadd (%p7104_p1), [#allocation9], 4294950912  ;;  %s4473_s23 = sshll.u32 %s6517_s15, 8  ;;  %s501_s16 = scalar_lea.sflag [#allocation12], %s487_s26 }
 0x111   : > { %s6532_s11 = scalar_lea.vmem [#allocation11], %s4473_s23 }
 0x112   : > { %6088 = dma.done.wait (%p7102_p10), %s501_s16, 36864  }
 0x113   : > { %6090 = vsyncadd (%p7102_p10), %s501_s16, 4294930432  ;;  %s4474_s19 = sshll.u32 %s6517_s15, 11  ;;  %s519_s29 = scalar_lea.sflag [#allocation15], %s6517_s15 }
 0x114   : > { %s6539_s28 = scalar_lea.vmem [#allocation13], %s4474_s19  ;;  %s522_s24 = scalar_lea.vmem [#allocation14], %s6520_s12 }
 0x115   : > { %6092 = dma.done.wait (%p7102_p10), %s519_s29, 64  }
 0x116   : > { %6094 = vsyncadd (%p7102_p10), %s519_s29, 4294967232  ;;  %v6134_v0 = vmov 0   ;;  %v6135_v1 = vmov 0.0   ;;  %vm620_vm0 = vcmask 1044480   ;;  %vm6136_vm1 = vmmov 1   ;;  %s7107_s22 = sld [smem:[#allocation34_spill]] }
 0x117   : > { %5138 = vset.pattern.permute.xlu0 %v6134_v0  ;;  %697 = vmatprep.mubr.f32.mxu0 %v6135_v1  ;;  %vm6549_vm2 = vmpackc.low %vm620_vm0, %vm6136_vm1  ;;  %s7108_s6 = sld [smem:[#allocation35_spill]]  ;;  %v601_v5 = vld [vmem:[#allocation5 + $0x8] sm:$0xff]  ;;  %v603_v7 = vld [vmem:[#allocation5 + $0x18] sm:$0xff]  ;;  %vm925_vm3 = vcmask 1043456   ;;  %v585_v32 = vlaneseq  ;;  %vm616_vm4 = vcmask 236544   ;;  %vm921_vm6 = vcmask 31744  }
 0x118   : > { %768 = vmatprep.mubr.f32.mxu1 %v6135_v1  ;;  %v605_v6 = vld [vmem:[#allocation5 + $0x28] sm:$0xff]  ;;  %v607_v8 = vld [vmem:[#allocation5 + $0x38] sm:$0xff]  ;;  %v600_v11 = vld [vmem:[#allocation5] sm:$0xff]  ;;  %vm6137_vm8 = vmmov 0   ;;  %s7109_s30 = sld [smem:[#allocation32_spill]]  ;;  %s4915_s13 = sshll.u32 %s6221_s21, 6 }
 0x119   : > { %v4972_v9 = vpack.c.bf16 %v605_v6, %v601_v5  ;;  %v4982_v10 = vpack.c.bf16 %v607_v8, %v603_v7  ;;  %v604_v12 = vld [vmem:[#allocation5 + $0x20] sm:$0xff]  ;;  %v602_v13 = vld [vmem:[#allocation5 + $0x10] sm:$0xff]  ;;  %v609_v16 = vld [vmem:[#allocation5 + $0x48] sm:$0xff]  ;;  %v586_v34 = vand.u32 127, %v585_v32  ;;  %s580_s3 = scalar_lea.vmem [#allocation17], %s6520_s12  ;;  %s7110_s14 = sld [smem:[#allocation40_spill]] }
 0x11a   : > { %v4974_v14 = vpack.c.bf16 %v604_v12, %v600_v11  ;;  %v606_v15 = vld [vmem:[#allocation5 + $0x30] sm:$0xff]  ;;  %v613_v17 = vld [vmem:[#allocation5 + $0x68] sm:$0x1f]  ;;  %v611_v20 = vld [vmem:[#allocation5 + $0x58] sm:$0xff]  ;;  %s4242_s0 = sshll.u32 %s580_s3, 4  ;;  %s4216_s23 = scalar_lea.sflag [#allocation18], %s6517_s15  ;;  %s6951_s0 = int_to_ptr.vmem [resolvable:$true] %s4242_s0 }
 0x11b   : > { %4973 = vmatprep.subr.bf16.mxu0 %v4972_v9  ;;  %4983 = vmatprep.subr.bf16.mxu1 %v4982_v10  ;;  %v4984_v18 = vpack.c.bf16 %v606_v15, %v602_v13  ;;  %v4976_v19 = vpack.c.bf16 %v613_v17, %v609_v16  ;;  %v615_v21 = vld [vmem:[#allocation5 + $0x78] sm:$0x1f]  ;;  %v608_v22 = vld [vmem:[#allocation5 + $0x40] sm:$0xff]  ;;  %v610_v25 = vld [vmem:[#allocation5 + $0x50] sm:$0xff]  ;;  %s5999_s16 = scalar_lea.vmem %s6951_s0, 64 }
 0x11c   : > { %v584_v3 = vld [vmem:[%s7107_s22] sm:$0xf]  ;;  %4975 = vmatpush1.bf16.msra.mxu0 %v4974_v14  ;;  %v4986_v23 = vpack.c.bf16 %v615_v21, %v611_v20  ;;  %v612_v24 = vld [vmem:[#allocation5 + $0x60] sm:$0x1f]  ;;  %v5142_v31 = vld [vmem:[#allocation10 + $0x4] ss:$16 sps:$4 sm:$0xff]   ;;  %p6000_p5 = scmp.ne.s32.totalorder %s6951_s0, %s5999_s16 }
 0x11d   : > { %v593_v4 = vld [vmem:[%s7108_s6] sm:$0xf]  ;;  %588 = vperm.xlu0 %5138, %v584_v3   ;;  %4985 = vmatpush1.bf16.msra.mxu1 %v4984_v18  ;;  %v4979_v27 = vpack.c.bf16 %v612_v24, %v608_v22  ;;  %v915_v29 = vld [vmem:[#allocation7] sm:$0xff]  ;;  %v916_v35 = vld [vmem:[#allocation7 + $0x8] sm:$0xff] }
 0x11e   : > { %v614_v26 = vld [vmem:[#allocation5 + $0x70] sm:$0x1f]  ;;  %4978 = vmatprep.subr.msk.bf16.mxu0 %vm6549_vm2, %v4976_v19  ;;  %4988 = vmatprep.subr.msk.bf16.mxu1 %vm6549_vm2, %v4986_v23  ;;  %v919_v30 = vcombine.high %v915_v29, %v915_v29  ;;  %v5140_v36 = vld [vmem:[#allocation10] ss:$16 sps:$4 sm:$0xff]   ;;  %v920_v39 = vcombine.high %v916_v35, %v916_v35  ;;  %v5146_v40 = vld [vmem:[#allocation10 + $0x24] ss:$16 sps:$4 sm:$0xff]  }
 0x11f   : > { %v4989_v28 = vpack.c.bf16 %v614_v26, %v610_v25  ;;  %v6568_v33 = vld [vmem:[#allocation2] sm:$0xff]  ;;  %v5144_v42 = vld [vmem:[#allocation10 + $0x20] ss:$16 sps:$4 sm:$0xff]   ;;  %v5149_v46 = vld [vmem:[#allocation10 + $0x44] ss:$16 sps:$4 sm:$0xff]   ;;  %p7111_p11 = scmp.ne.s32.totalorder %s7109_s30, 0 }
 0x120   : > { %4981 = vmatpush1.bf16.msk.msra.mxu0 %vm6549_vm2, %v4979_v27  ;;  %v779_v37 = vcombine.high %v6568_v33, %v6568_v33  ;;  %v6576_v44 = vld [vmem:[#allocation2 + $0x8] sm:$0xff] }
 0x121   : > { %595 = vperm.xlu0 %5138, %v593_v4   ;;  %4991 = vmatpush1.bf16.msk.msra.mxu1 %vm6549_vm2, %v4989_v28  ;;  %v5152_v47 = vld [vmem:[#allocation10 + $0x204] ss:$16 sps:$4 sm:$0xff]   ;;  %v780_v49 = vcombine.high %v6576_v44, %v6576_v44  ;;  %v5147_v50 = vld [vmem:[#allocation10 + $0x40] ss:$16 sps:$4 sm:$0xff]   ;;  %p6001_p4 = pnand %p6000_p5, %p7111_p11 }
 0x122   : > { %1716 = vmatprep.subr.bf16.mxu0 %v5142_v31  ;;  %4486 = vmatprep.subr.msk.mxu1 %vm925_vm3, %v919_v30  ;;  %v6574_v43 = vpack.c.bf16 %v779_v37, %v779_v37  ;;  %v5150_v51 = vld [vmem:[#allocation10 + $0x200] ss:$16 sps:$4 sm:$0xff]   ;;  %v5155_v52 = vld [vmem:[#allocation10 + $0x64] ss:$16 sps:$4 sm:$0xff]  }
 0x123   : > { %v5158_v53 = vld [vmem:[#allocation10 + $0x224] ss:$16 sps:$4 sm:$0xff]   ;;  %v6591_v54 = vpack.c.bf16 %v780_v49, %v780_v49  ;;  %v5153_v55 = vld [vmem:[#allocation10 + $0x60] ss:$16 sps:$4 sm:$0xff]   ;;  %v6598_v49 = vpack.c.bf16 %v6568_v33, %v6568_v33  ;;  %v6604_v33 = vpack.c.bf16 %v6576_v44, %v6576_v44  ;;  %v5257_v44 = vld [vmem:[#allocation10 + $0x88] ss:$16 sps:$4 sm:$0xff]   ;;  %p6002_p13 = pneg %p6001_p4 }
 0x124   : > { %v5156_v56 = vld [vmem:[#allocation10 + $0x220] ss:$16 sps:$4 sm:$0xff]   ;;  %v5161_v57 = vld [vmem:[#allocation10 + $0x84] ss:$16 sps:$4 sm:$0xff]  }
 0x125   : > { %v5164_v58 = vld [vmem:[#allocation10 + $0x244] ss:$16 sps:$4 sm:$0xff]   ;;  %v5159_v59 = vld [vmem:[#allocation10 + $0x80] ss:$16 sps:$4 sm:$0xff]  }
 0x126   : > { %v5162_v60 = vld [vmem:[#allocation10 + $0x240] ss:$16 sps:$4 sm:$0xff]   ;;  %v5167_v61 = vld [vmem:[#allocation10 + $0xa4] ss:$16 sps:$4 sm:$0xff]  }
 0x127   : > { %v5170_v62 = vld [vmem:[#allocation10 + $0x264] ss:$16 sps:$4 sm:$0xff]   ;;  %v5165_v63 = vld [vmem:[#allocation10 + $0xa0] ss:$16 sps:$4 sm:$0xff]  }
 0x128   : > { %v5168_v0 = vld [vmem:[#allocation10 + $0x260] ss:$16 sps:$4 sm:$0xff]   ;;  %v5173_v2 = vld [vmem:[#allocation10 + $0xc4] ss:$16 sps:$4 sm:$0xff]  }
 0x129   : > { %v5176_v3 = vld [vmem:[#allocation10 + $0x284] ss:$16 sps:$4 sm:$0xff]   ;;  %v5171_v4 = vld [vmem:[#allocation10 + $0xc0] ss:$16 sps:$4 sm:$0xff]  }
 0x12a   : > { %v5174_v5 = vld [vmem:[#allocation10 + $0x280] ss:$16 sps:$4 sm:$0xff]   ;;  %v5179_v6 = vld [vmem:[#allocation10 + $0xe4] ss:$16 sps:$4 sm:$0xff]  }
 0x12b   : > { %v5182_v7 = vld [vmem:[#allocation10 + $0x2a4] ss:$16 sps:$4 sm:$0xff]   ;;  %v5177_v8 = vld [vmem:[#allocation10 + $0xe0] ss:$16 sps:$4 sm:$0xff]  }
 0x12c   : > { %v5180_v9 = vld [vmem:[#allocation10 + $0x2a0] ss:$16 sps:$4 sm:$0xff]   ;;  %v5185_v10 = vld [vmem:[#allocation10 + $0x104] ss:$16 sps:$4 sm:$0xff]  }
 0x12d   : > { %v5188_v11 = vld [vmem:[#allocation10 + $0x2c4] ss:$16 sps:$4 sm:$0xff]   ;;  %v5183_v12 = vld [vmem:[#allocation10 + $0x100] ss:$16 sps:$4 sm:$0xff]  }
 0x12e   : > { %v5186_v13 = vld [vmem:[#allocation10 + $0x2c0] ss:$16 sps:$4 sm:$0xff]   ;;  %v5191_v14 = vld [vmem:[#allocation10 + $0x124] ss:$16 sps:$4 sm:$0xff]  }
 0x12f   : > { %v5194_v15 = vld [vmem:[#allocation10 + $0x2e4] ss:$16 sps:$4 sm:$0xff]   ;;  %v5189_v16 = vld [vmem:[#allocation10 + $0x120] ss:$16 sps:$4 sm:$0xff]  }
 0x130   : > { %v5192_v17 = vld [vmem:[#allocation10 + $0x2e0] ss:$16 sps:$4 sm:$0xff]   ;;  %v5197_v18 = vld [vmem:[#allocation10 + $0x144] ss:$16 sps:$4 sm:$0xff]  }
 0x131   : > { %v5200_v19 = vld [vmem:[#allocation10 + $0x304] ss:$16 sps:$4 sm:$0xff]   ;;  %v5195_v20 = vld [vmem:[#allocation10 + $0x140] ss:$16 sps:$4 sm:$0xff]  }
 0x132   : > { %v5198_v21 = vld [vmem:[#allocation10 + $0x300] ss:$16 sps:$4 sm:$0xff]   ;;  %v5203_v22 = vld [vmem:[#allocation10 + $0x164] ss:$16 sps:$4 sm:$0xff]  }
 0x133   : > { %v5206_v23 = vld [vmem:[#allocation10 + $0x324] ss:$16 sps:$4 sm:$0xff]   ;;  %v5201_v24 = vld [vmem:[#allocation10 + $0x160] ss:$16 sps:$4 sm:$0xff]  }
 0x134   : > { %v5204_v25 = vld [vmem:[#allocation10 + $0x320] ss:$16 sps:$4 sm:$0xff]   ;;  %v5209_v26 = vld [vmem:[#allocation10 + $0x184] ss:$16 sps:$4 sm:$0xff]  }
 0x135   : > { %v5212_v27 = vld [vmem:[#allocation10 + $0x344] ss:$16 sps:$4 sm:$0xff]   ;;  %v5207_v28 = vld [vmem:[#allocation10 + $0x180] ss:$16 sps:$4 sm:$0xff]  }
 0x136   : > { %v5215_v30 = vld [vmem:[#allocation10 + $0x1a4] ss:$16 sps:$4 sm:$0xff]  }
 0x137   : > { %v5218_v31 = vld [vmem:[#allocation10 + $0x364] ss:$16 sps:$4 sm:$0xff]  }
 0x138   : > { %v5224_v37 = vld [vmem:[#allocation10 + $0x384] ss:$16 sps:$4 sm:$0xff]  }
 0x19c   : > { %v589_v38 = vpop.permute.xlu0 %588 }
 0x19d   : > { %vm590_vm5 = vcmp.eq.s32.totalorder %v586_v34, %v589_v38  ;;  %v5219_v38 = vld [vmem:[#allocation10 + $0x1c0] ss:$16 sps:$4 sm:$0xff]  }
 0x19e   : > { %v4478_v41 = vsel %vm590_vm5, 1.0, %v6135_v1 }
 0x19f   : > { %4482 = vmatmul.mubr.msk.f32.vlgmr.msra.gmra.mrb[0].mxu0 %vm616_vm4, %v4478_v41  ;;  %4485 = vmatmul.mubr.msk.f32.vlgmr.msra.gmra.mrb[0].mxu1 %vm616_vm4, %v4478_v41  ;;  %v5230_v41 = vld [vmem:[#allocation10 + $0x3a4] ss:$16 sps:$4 sm:$0xff]  }
 0x1a0   : > { %4487 = vmatpush1.msk.msra.mxu1 %vm925_vm3, %v915_v29  ;;  %1717 = vmatpush1.bf16.msra.mxu0 %v5140_v36  ;;  %v596_v45 = vpop.permute.xlu0 %595  ;;  %v5210_v29 = vld [vmem:[#allocation10 + $0x340] ss:$16 sps:$4 sm:$0xff]   ;;  %v5221_v36 = vld [vmem:[#allocation10 + $0x1c4] ss:$16 sps:$4 sm:$0xff]  }
 0x1a1   : > { %vm597_vm7 = vcmp.eq.s32.totalorder %v586_v34, %v596_v45  ;;  %998 = vmatprep.mubr.f32.mxu1 %v6135_v1  ;;  %4489 = vmatprep.subr.msk.mxu1 %vm925_vm3, %v920_v39  ;;  %v5213_v34 = vld [vmem:[#allocation10 + $0x1a0] ss:$16 sps:$4 sm:$0xff]  }
 0x1a2   : > { %v6582_v48 = vsel %vm597_vm7, 1.0, %v6135_v1  ;;  %1718 = vmatprep.subr.bf16.mxu0 %v5146_v40  ;;  %1748 = vmatprep.mubr.bf16.mxu0 %v6574_v43  ;;  %v5222_v39 = vld [vmem:[#allocation10 + $0x380] ss:$16 sps:$4 sm:$0xff]   ;;  %v5227_v40 = vld [vmem:[#allocation10 + $0x1e4] ss:$16 sps:$4 sm:$0xff]  }
 0x1a3   : > { %4488 = vmatmul.mubr.msk.f32.vlgmr.msra.gmra.mrb[2].mxu1 %vm921_vm6, %v6582_v48  ;;  %v5228_v45 = vld [vmem:[#allocation10 + $0x3a0] ss:$16 sps:$4 sm:$0xff]  }
 0x1a4   : > { %4490 = vmatpush1.msk.msra.mxu1 %vm925_vm3, %v916_v35  ;;  %1719 = vmatpush1.bf16.msra.mxu0 %v5144_v42  ;;  %v5216_v35 = vld [vmem:[#allocation10 + $0x360] ss:$16 sps:$4 sm:$0xff]  }
 0x1a5   : > { %1069 = vmatprep.mubr.f32.mxu1 %v6135_v1  ;;  %1720 = vmatprep.subr.bf16.mxu0 %v5149_v46  ;;  %v5225_v42 = vld [vmem:[#allocation10 + $0x1e0] ss:$16 sps:$4 sm:$0xff]   ;;  %v5234_v46 = vld [vmem:[#allocation10 + $0x3c4] ss:$16 sps:$4 sm:$0xff]  }
 0x1a6   : > { %1757 = vmatprep.subr.bf16.mxu1 %v5152_v47  ;;  %v5237_v47 = vld [vmem:[#allocation10 + $0xc] ss:$16 sps:$4 sm:$0xff]  }
 0x1a7   : > { %4491 = vmatmul.mubr.msk.f32.vlgmr.msra.gmra.mrb[4].mxu1 %vm921_vm6, %v6582_v48 }
 0x1a8   : > { %1721 = vmatpush1.bf16.msra.mxu0 %v5147_v50  ;;  %1758 = vmatpush1.bf16.msra.mxu1 %v5150_v51  ;;  %v5232_v50 = vld [vmem:[#allocation10 + $0x3c0] ss:$16 sps:$4 sm:$0xff]   ;;  %v5235_v51 = vld [vmem:[#allocation10 + $0x8] ss:$16 sps:$4 sm:$0xff]  }
 0x1a9   : > { %1722 = vmatprep.subr.bf16.mxu0 %v5155_v52  ;;  %1759 = vmatprep.subr.bf16.mxu1 %v5158_v53  ;;  %v5240_v52 = vld [vmem:[#allocation10 + $0x3e4] ss:$16 sps:$4 sm:$0xff]   ;;  %v5243_v53 = vld [vmem:[#allocation10 + $0x2c] ss:$16 sps:$4 sm:$0xff]  }
 0x1aa   : > { %1789 = vmatprep.mubr.bf16.mxu1 %v6591_v54 }
 0x1ac   : > { %1723 = vmatpush1.bf16.msra.mxu0 %v5153_v55  ;;  %1760 = vmatpush1.bf16.msra.mxu1 %v5156_v56  ;;  %v5238_v55 = vld [vmem:[#allocation10 + $0x3e0] ss:$16 sps:$4 sm:$0xff]   ;;  %v5241_v56 = vld [vmem:[#allocation10 + $0x28] ss:$16 sps:$4 sm:$0xff]  }
 0x1ad   : > { %1724 = vmatprep.subr.bf16.mxu0 %v5161_v57  ;;  %1761 = vmatprep.subr.bf16.mxu1 %v5164_v58  ;;  %v5247_v57 = vld [vmem:[#allocation10 + $0x4c] ss:$16 sps:$4 sm:$0xff]  }
 0x1ae   : > { %v5250_v58 = vld [vmem:[#allocation10 + $0x20c] ss:$16 sps:$4 sm:$0xff]  }
 0x1b0   : > { %1725 = vmatpush1.bf16.msra.mxu0 %v5159_v59  ;;  %1762 = vmatpush1.bf16.msra.mxu1 %v5162_v60  ;;  %v5245_v59 = vld [vmem:[#allocation10 + $0x48] ss:$16 sps:$4 sm:$0xff]  }
 0x1b1   : > { %1726 = vmatprep.subr.bf16.mxu0 %v5167_v61  ;;  %1763 = vmatprep.subr.bf16.mxu1 %v5170_v62  ;;  %v5248_v60 = vld [vmem:[#allocation10 + $0x208] ss:$16 sps:$4 sm:$0xff]   ;;  %v5253_v61 = vld [vmem:[#allocation10 + $0x6c] ss:$16 sps:$4 sm:$0xff]  }
 0x1b2   : > { %v5256_v62 = vld [vmem:[#allocation10 + $0x22c] ss:$16 sps:$4 sm:$0xff]  }
 0x1b4   : > { %1727 = vmatpush1.bf16.msra.mxu0 %v5165_v63  ;;  %1764 = vmatpush1.bf16.msra.mxu1 %v5168_v0  ;;  %v5251_v63 = vld [vmem:[#allocation10 + $0x68] ss:$16 sps:$4 sm:$0xff]  }
 0x1b5   : > { %1728 = vmatprep.subr.bf16.mxu0 %v5173_v2  ;;  %1765 = vmatprep.subr.bf16.mxu1 %v5176_v3  ;;  %v5254_v0 = vld [vmem:[#allocation10 + $0x228] ss:$16 sps:$4 sm:$0xff]   ;;  %v5259_v2 = vld [vmem:[#allocation10 + $0x8c] ss:$16 sps:$4 sm:$0xff]  }
 0x1b6   : > { %v5262_v3 = vld [vmem:[#allocation10 + $0x24c] ss:$16 sps:$4 sm:$0xff]  }
 0x1b8   : > { %1729 = vmatpush1.bf16.msra.mxu0 %v5171_v4  ;;  %1766 = vmatpush1.bf16.msra.mxu1 %v5174_v5  ;;  %v5260_v4 = vld [vmem:[#allocation10 + $0x248] ss:$16 sps:$4 sm:$0xff]   ;;  %v5265_v5 = vld [vmem:[#allocation10 + $0xac] ss:$16 sps:$4 sm:$0xff]  }
 0x1b9   : > { %1730 = vmatprep.subr.bf16.mxu0 %v5179_v6  ;;  %1767 = vmatprep.subr.bf16.mxu1 %v5182_v7  ;;  %v5268_v6 = vld [vmem:[#allocation10 + $0x26c] ss:$16 sps:$4 sm:$0xff]   ;;  %v5263_v7 = vld [vmem:[#allocation10 + $0xa8] ss:$16 sps:$4 sm:$0xff]  }
 0x1bc   : > { %1731 = vmatpush1.bf16.msra.mxu0 %v5177_v8  ;;  %1768 = vmatpush1.bf16.msra.mxu1 %v5180_v9  ;;  %v5266_v8 = vld [vmem:[#allocation10 + $0x268] ss:$16 sps:$4 sm:$0xff]   ;;  %v5271_v9 = vld [vmem:[#allocation10 + $0xcc] ss:$16 sps:$4 sm:$0xff]  }
 0x1bd   : > { %1732 = vmatprep.subr.bf16.mxu0 %v5185_v10  ;;  %1769 = vmatprep.subr.bf16.mxu1 %v5188_v11  ;;  %v5274_v10 = vld [vmem:[#allocation10 + $0x28c] ss:$16 sps:$4 sm:$0xff]   ;;  %v5269_v11 = vld [vmem:[#allocation10 + $0xc8] ss:$16 sps:$4 sm:$0xff]  }
 0x1c0   : > { %1733 = vmatpush1.bf16.msra.mxu0 %v5183_v12  ;;  %1770 = vmatpush1.bf16.msra.mxu1 %v5186_v13  ;;  %v5272_v12 = vld [vmem:[#allocation10 + $0x288] ss:$16 sps:$4 sm:$0xff]   ;;  %v5277_v13 = vld [vmem:[#allocation10 + $0xec] ss:$16 sps:$4 sm:$0xff]  }
 0x1c1   : > { %1734 = vmatprep.subr.bf16.mxu0 %v5191_v14  ;;  %1771 = vmatprep.subr.bf16.mxu1 %v5194_v15  ;;  %v5280_v14 = vld [vmem:[#allocation10 + $0x2ac] ss:$16 sps:$4 sm:$0xff]   ;;  %v5275_v15 = vld [vmem:[#allocation10 + $0xe8] ss:$16 sps:$4 sm:$0xff]  }
 0x1c4   : > { %1735 = vmatpush1.bf16.msra.mxu0 %v5189_v16  ;;  %1772 = vmatpush1.bf16.msra.mxu1 %v5192_v17  ;;  %v5278_v16 = vld [vmem:[#allocation10 + $0x2a8] ss:$16 sps:$4 sm:$0xff]   ;;  %v5283_v17 = vld [vmem:[#allocation10 + $0x10c] ss:$16 sps:$4 sm:$0xff]  }
 0x1c5   : > { %1736 = vmatprep.subr.bf16.mxu0 %v5197_v18  ;;  %1773 = vmatprep.subr.bf16.mxu1 %v5200_v19  ;;  %v5286_v18 = vld [vmem:[#allocation10 + $0x2cc] ss:$16 sps:$4 sm:$0xff]   ;;  %v5281_v19 = vld [vmem:[#allocation10 + $0x108] ss:$16 sps:$4 sm:$0xff]  }
 0x1c8   : > { %1737 = vmatpush1.bf16.msra.mxu0 %v5195_v20  ;;  %1774 = vmatpush1.bf16.msra.mxu1 %v5198_v21  ;;  %v5284_v20 = vld [vmem:[#allocation10 + $0x2c8] ss:$16 sps:$4 sm:$0xff]   ;;  %v5289_v21 = vld [vmem:[#allocation10 + $0x12c] ss:$16 sps:$4 sm:$0xff]  }
 0x1c9   : > { %1738 = vmatprep.subr.bf16.mxu0 %v5203_v22  ;;  %1775 = vmatprep.subr.bf16.mxu1 %v5206_v23  ;;  %v5292_v22 = vld [vmem:[#allocation10 + $0x2ec] ss:$16 sps:$4 sm:$0xff]   ;;  %v5287_v23 = vld [vmem:[#allocation10 + $0x128] ss:$16 sps:$4 sm:$0xff]  }
 0x1cc   : > { %1739 = vmatpush1.bf16.msra.mxu0 %v5201_v24  ;;  %1776 = vmatpush1.bf16.msra.mxu1 %v5204_v25  ;;  %v5290_v24 = vld [vmem:[#allocation10 + $0x2e8] ss:$16 sps:$4 sm:$0xff]   ;;  %v5295_v25 = vld [vmem:[#allocation10 + $0x14c] ss:$16 sps:$4 sm:$0xff]  }
 0x1cd   : > { %1740 = vmatprep.subr.bf16.mxu0 %v5209_v26  ;;  %1777 = vmatprep.subr.bf16.mxu1 %v5212_v27  ;;  %v5298_v26 = vld [vmem:[#allocation10 + $0x30c] ss:$16 sps:$4 sm:$0xff]   ;;  %v5293_v27 = vld [vmem:[#allocation10 + $0x148] ss:$16 sps:$4 sm:$0xff]  }
 0x1d0   : > { %1741 = vmatpush1.bf16.msra.mxu0 %v5207_v28  ;;  %1778 = vmatpush1.bf16.msra.mxu1 %v5210_v29  ;;  %v5296_v28 = vld [vmem:[#allocation10 + $0x308] ss:$16 sps:$4 sm:$0xff]   ;;  %v5301_v29 = vld [vmem:[#allocation10 + $0x16c] ss:$16 sps:$4 sm:$0xff]  }
 0x1d1   : > { %1742 = vmatprep.subr.bf16.mxu0 %v5215_v30  ;;  %1779 = vmatprep.subr.bf16.mxu1 %v5218_v31  ;;  %v5304_v30 = vld [vmem:[#allocation10 + $0x32c] ss:$16 sps:$4 sm:$0xff]   ;;  %v5299_v31 = vld [vmem:[#allocation10 + $0x168] ss:$16 sps:$4 sm:$0xff]  }
 0x1d4   : > { %1743 = vmatpush1.bf16.msra.mxu0 %v5213_v34  ;;  %1780 = vmatpush1.bf16.msra.mxu1 %v5216_v35  ;;  %v5302_v34 = vld [vmem:[#allocation10 + $0x328] ss:$16 sps:$4 sm:$0xff]   ;;  %v5307_v35 = vld [vmem:[#allocation10 + $0x18c] ss:$16 sps:$4 sm:$0xff]  }
 0x1d5   : > { %1744 = vmatprep.subr.bf16.mxu0 %v5221_v36  ;;  %1781 = vmatprep.subr.bf16.mxu1 %v5224_v37  ;;  %v5310_v36 = vld [vmem:[#allocation10 + $0x34c] ss:$16 sps:$4 sm:$0xff]   ;;  %v5305_v37 = vld [vmem:[#allocation10 + $0x188] ss:$16 sps:$4 sm:$0xff]  }
 0x1d8   : > { %1745 = vmatpush1.bf16.msra.mxu0 %v5219_v38  ;;  %1782 = vmatpush1.bf16.msra.mxu1 %v5222_v39  ;;  %v5308_v38 = vld [vmem:[#allocation10 + $0x348] ss:$16 sps:$4 sm:$0xff]   ;;  %v5313_v39 = vld [vmem:[#allocation10 + $0x1ac] ss:$16 sps:$4 sm:$0xff]  }
 0x1d9   : > { %1746 = vmatprep.subr.bf16.mxu0 %v5227_v40  ;;  %1783 = vmatprep.subr.bf16.mxu1 %v5230_v41  ;;  %v5316_v40 = vld [vmem:[#allocation10 + $0x36c] ss:$16 sps:$4 sm:$0xff]   ;;  %v5311_v41 = vld [vmem:[#allocation10 + $0x1a8] ss:$16 sps:$4 sm:$0xff]  }
 0x1dc   : > { %1747 = vmatpush1.bf16.msra.mxu0 %v5225_v42  ;;  %1784 = vmatpush1.bf16.msra.mxu1 %v5228_v45  ;;  %v5314_v42 = vld [vmem:[#allocation10 + $0x368] ss:$16 sps:$4 sm:$0xff]   ;;  %v5319_v45 = vld [vmem:[#allocation10 + $0x1cc] ss:$16 sps:$4 sm:$0xff]  }
 0x1dd   : > { %1785 = vmatprep.subr.bf16.mxu1 %v5234_v46  ;;  %1798 = vmatprep.subr.bf16.mxu0 %v5237_v47  ;;  %v5322_v46 = vld [vmem:[#allocation10 + $0x38c] ss:$16 sps:$4 sm:$0xff]   ;;  %v5317_v47 = vld [vmem:[#allocation10 + $0x1c8] ss:$16 sps:$4 sm:$0xff]  }
 0x1df   : > { %1749 = vmatmul.mubr.bf16.vlgmr.msra.gmra.mrb[4].mxu0 %v6598_v49 }
 0x1e0   : > { %1786 = vmatpush1.bf16.msra.mxu1 %v5232_v50  ;;  %1799 = vmatpush1.bf16.msra.mxu0 %v5235_v51  ;;  %v5320_v50 = vld [vmem:[#allocation10 + $0x388] ss:$16 sps:$4 sm:$0xff]   ;;  %v5325_v51 = vld [vmem:[#allocation10 + $0x1ec] ss:$16 sps:$4 sm:$0xff]  }
 0x1e1   : > { %1787 = vmatprep.subr.bf16.mxu1 %v5240_v52  ;;  %1800 = vmatprep.subr.bf16.mxu0 %v5243_v53  ;;  %v5328_v52 = vld [vmem:[#allocation10 + $0x3ac] ss:$16 sps:$4 sm:$0xff]   ;;  %v5323_v53 = vld [vmem:[#allocation10 + $0x1e8] ss:$16 sps:$4 sm:$0xff]  }
 0x1e2   : > { %1830 = vmatprep.mubr.bf16.mxu0 %v6574_v43 }
 0x1e4   : > { %1788 = vmatpush1.bf16.msra.mxu1 %v5238_v55  ;;  %1801 = vmatpush1.bf16.msra.mxu0 %v5241_v56  ;;  %v5326_v55 = vld [vmem:[#allocation10 + $0x3a8] ss:$16 sps:$4 sm:$0xff]   ;;  %v5331_v56 = vld [vmem:[#allocation10 + $0x3cc] ss:$16 sps:$4 sm:$0xff]  }
 0x1e5   : > { %1802 = vmatprep.subr.bf16.mxu0 %v5247_v57  ;;  %1839 = vmatprep.subr.bf16.mxu1 %v5250_v58  ;;  %v5329_v57 = vld [vmem:[#allocation10 + $0x3c8] ss:$16 sps:$4 sm:$0xff]   ;;  %v5334_v58 = vld [vmem:[#allocation10 + $0x3ec] ss:$16 sps:$4 sm:$0xff]  }
 0x1e7   : > { %1790 = vmatmul.mubr.bf16.vlgmr.msra.gmra.mrb[8].mxu1 %v6604_v33 }
 0x1e8   : > { %1803 = vmatpush1.bf16.msra.mxu0 %v5245_v59  ;;  %1840 = vmatpush1.bf16.msra.mxu1 %v5248_v60  ;;  %v1944_v59 = vld [vmem:[%s491_s25] sm:$0xf]  ;;  %v5335_v60 = vld [vmem:[%s6532_s11 + $0xc0] sm:$0xff]   ;;  %s6949_s25 = scalar_lea.hbm %s7110_s14, %s4915_s13 }
 0x1e9   : > { %1804 = vmatprep.subr.bf16.mxu0 %v5253_v61  ;;  %1841 = vmatprep.subr.bf16.mxu1 %v5256_v62  ;;  %v5332_v61 = vld [vmem:[#allocation10 + $0x3e8] ss:$16 sps:$4 sm:$0xff]   ;;  %v5336_v62 = vld [vmem:[%s6532_s11 + $0x40] sm:$0xff]  }
 0x1ea   : > { %1871 = vmatprep.mubr.bf16.mxu1 %v6591_v54 }
 0x1ec   : > { %1805 = vmatpush1.bf16.msra.mxu0 %v5251_v63  ;;  %1842 = vmatpush1.bf16.msra.mxu1 %v5254_v0  ;;  %v5337_v63 = vld [vmem:[%s6532_s11 + $0x80] sm:$0xff]  }
 0x1ed   : > { %1806 = vmatprep.subr.bf16.mxu0 %v5259_v2  ;;  %1843 = vmatprep.subr.bf16.mxu1 %v5262_v3  ;;  %v5338_v0 = vld [vmem:[%s6532_s11] sm:$0xff]   ;;  %v5339_v2 = vld [vmem:[%s6532_s11 + $0xc8] sm:$0xff]  }
 0x1ee   : > { %v5340_v3 = vld [vmem:[%s6532_s11 + $0x48] sm:$0xff]  }
 0x1f0   : > { %1807 = vmatpush1.bf16.msra.mxu0 %v5257_v44  ;;  %1844 = vmatpush1.bf16.msra.mxu1 %v5260_v4  ;;  %v5342_v44 = vld [vmem:[%s6532_s11 + $0x8] sm:$0xff]   ;;  %v5343_v4 = vld [vmem:[%s6532_s11 + $0xd0] sm:$0xff]  }
 0x1f1   : > { %1808 = vmatprep.subr.bf16.mxu0 %v5265_v5  ;;  %1845 = vmatprep.subr.bf16.mxu1 %v5268_v6  ;;  %v5344_v5 = vld [vmem:[%s6532_s11 + $0x50] sm:$0xff]  }
 0x1f2   : > { %v5346_v6 = vld [vmem:[%s6532_s11 + $0x10] sm:$0xff]  }
 0x1f4   : > { %1809 = vmatpush1.bf16.msra.mxu0 %v5263_v7  ;;  %1846 = vmatpush1.bf16.msra.mxu1 %v5266_v8  ;;  %v5347_v7 = vld [vmem:[%s6532_s11 + $0xd8] sm:$0xff]  }
 0x1f5   : > { %1810 = vmatprep.subr.bf16.mxu0 %v5271_v9  ;;  %1847 = vmatprep.subr.bf16.mxu1 %v5274_v10  ;;  %v5348_v8 = vld [vmem:[%s6532_s11 + $0x58] sm:$0xff]   ;;  %v5352_v10 = vld [vmem:[%s6532_s11 + $0x60] sm:$0xff]  }
 0x1f6   : > { %v5349_v9 = vld [vmem:[%s6532_s11 + $0x98] sm:$0xff]  }
 0x1f8   : > { %1811 = vmatpush1.bf16.msra.mxu0 %v5269_v11  ;;  %1848 = vmatpush1.bf16.msra.mxu1 %v5272_v12  ;;  %v5353_v11 = vld [vmem:[%s6532_s11 + $0xa0] sm:$0xff]  }
 0x1f9   : > { %1812 = vmatprep.subr.bf16.mxu0 %v5277_v13  ;;  %1849 = vmatprep.subr.bf16.mxu1 %v5280_v14  ;;  %v5354_v12 = vld [vmem:[%s6532_s11 + $0x20] sm:$0xff]   ;;  %v5355_v13 = vld [vmem:[%s6532_s11 + $0xe8] sm:$0xff]  }
 0x1fa   : > { %v5356_v14 = vld [vmem:[%s6532_s11 + $0x68] sm:$0xff]  }
 0x1fc   : > { %1813 = vmatpush1.bf16.msra.mxu0 %v5275_v15  ;;  %1850 = vmatpush1.bf16.msra.mxu1 %v5278_v16  ;;  %v5357_v15 = vld [vmem:[%s6532_s11 + $0xa8] sm:$0xff]  }
 0x1fd   : > { %1814 = vmatprep.subr.bf16.mxu0 %v5283_v17  ;;  %1851 = vmatprep.subr.bf16.mxu1 %v5286_v18  ;;  %v5358_v16 = vld [vmem:[%s6532_s11 + $0x28] sm:$0xff]   ;;  %v5359_v17 = vld [vmem:[%s6532_s11 + $0xf0] sm:$0xff]  }
 0x1fe   : > { %v5360_v18 = vld [vmem:[%s6532_s11 + $0x70] sm:$0xff]  }
 0x200   : > { %1815 = vmatpush1.bf16.msra.mxu0 %v5281_v19  ;;  %1852 = vmatpush1.bf16.msra.mxu1 %v5284_v20  ;;  %v5361_v19 = vld [vmem:[%s6532_s11 + $0xb0] sm:$0xff]  }
 0x201   : > { %1816 = vmatprep.subr.bf16.mxu0 %v5289_v21  ;;  %1853 = vmatprep.subr.bf16.mxu1 %v5292_v22  ;;  %v5362_v20 = vld [vmem:[%s6532_s11 + $0x30] sm:$0xff]   ;;  %v5363_v21 = vld [vmem:[%s6532_s11 + $0xf8] sm:$0xff]  }
 0x202   : > { %v5364_v22 = vld [vmem:[%s6532_s11 + $0x78] sm:$0xff]  }
 0x204   : > { %1817 = vmatpush1.bf16.msra.mxu0 %v5287_v23  ;;  %1854 = vmatpush1.bf16.msra.mxu1 %v5290_v24  ;;  %v5365_v23 = vld [vmem:[%s6532_s11 + $0xb8] sm:$0xff]  }
 0x205   : > { %1818 = vmatprep.subr.bf16.mxu0 %v5295_v25  ;;  %1855 = vmatprep.subr.bf16.mxu1 %v5298_v26  ;;  %v5366_v24 = vld [vmem:[%s6532_s11 + $0x38] sm:$0xff]   ;;  %v5372_v26 = vld [vmem:[%s6539_s28 + $0x4] ss:$16 sps:$4 sm:$0xff]  }
 0x206   : > { %v5369_v25 = vld [vmem:[%s6539_s28 + $0xc] ss:$16 sps:$4 sm:$0xff]  }
 0x208   : > { %1819 = vmatpush1.bf16.msra.mxu0 %v5293_v27  ;;  %1856 = vmatpush1.bf16.msra.mxu1 %v5296_v28  ;;  %v5367_v27 = vld [vmem:[%s6539_s28 + $0x8] ss:$16 sps:$4 sm:$0xff]   ;;  %v5370_v28 = vld [vmem:[%s6539_s28] ss:$16 sps:$4 sm:$0xff]  }
 0x209   : > { %1820 = vmatprep.subr.bf16.mxu0 %v5301_v29  ;;  %1857 = vmatprep.subr.bf16.mxu1 %v5304_v30  ;;  %v5375_v29 = vld [vmem:[%s6539_s28 + $0x2c] ss:$16 sps:$4 sm:$0xff]   ;;  %v5378_v30 = vld [vmem:[%s6539_s28 + $0x24] ss:$16 sps:$4 sm:$0xff]  }
 0x20c   : > { %1821 = vmatpush1.bf16.msra.mxu0 %v5299_v31  ;;  %1858 = vmatpush1.bf16.msra.mxu1 %v5302_v34  ;;  %v5373_v31 = vld [vmem:[%s6539_s28 + $0x28] ss:$16 sps:$4 sm:$0xff]   ;;  %v5376_v34 = vld [vmem:[%s6539_s28 + $0x20] ss:$16 sps:$4 sm:$0xff]  }
 0x20d   : > { %1822 = vmatprep.subr.bf16.mxu0 %v5307_v35  ;;  %1859 = vmatprep.subr.bf16.mxu1 %v5310_v36  ;;  %v5381_v35 = vld [vmem:[%s6539_s28 + $0x4c] ss:$16 sps:$4 sm:$0xff]   ;;  %v5384_v36 = vld [vmem:[%s6539_s28 + $0x44] ss:$16 sps:$4 sm:$0xff]  }
 0x210   : > { %1823 = vmatpush1.bf16.msra.mxu0 %v5305_v37  ;;  %1860 = vmatpush1.bf16.msra.mxu1 %v5308_v38  ;;  %v5379_v37 = vld [vmem:[%s6539_s28 + $0x48] ss:$16 sps:$4 sm:$0xff]   ;;  %v5390_v38 = vld [vmem:[%s6539_s28 + $0x64] ss:$16 sps:$4 sm:$0xff]  }
 0x211   : > { %1824 = vmatprep.subr.bf16.mxu0 %v5313_v39  ;;  %1861 = vmatprep.subr.bf16.mxu1 %v5316_v40  ;;  %v5385_v39 = vld [vmem:[%s6539_s28 + $0x68] ss:$16 sps:$4 sm:$0xff]   ;;  %v5388_v40 = vld [vmem:[%s6539_s28 + $0x60] ss:$16 sps:$4 sm:$0xff]  }
 0x214   : > { %1825 = vmatpush1.bf16.msra.mxu0 %v5311_v41  ;;  %1862 = vmatpush1.bf16.msra.mxu1 %v5314_v42  ;;  %v5393_v41 = vld [vmem:[%s6539_s28 + $0x8c] ss:$16 sps:$4 sm:$0xff]   ;;  %v5396_v42 = vld [vmem:[%s6539_s28 + $0x84] ss:$16 sps:$4 sm:$0xff]  }
 0x215   : > { %1826 = vmatprep.subr.bf16.mxu0 %v5319_v45  ;;  %1863 = vmatprep.subr.bf16.mxu1 %v5322_v46  ;;  %v5391_v45 = vld [vmem:[%s6539_s28 + $0x88] ss:$16 sps:$4 sm:$0xff]   ;;  %v5394_v46 = vld [vmem:[%s6539_s28 + $0x80] ss:$16 sps:$4 sm:$0xff]  }
 0x218   : > { %1827 = vmatpush1.bf16.msra.mxu0 %v5317_v47  ;;  %1864 = vmatpush1.bf16.msra.mxu1 %v5320_v50  ;;  %v5399_v47 = vld [vmem:[%s6539_s28 + $0xac] ss:$16 sps:$4 sm:$0xff]   ;;  %v5402_v50 = vld [vmem:[%s6539_s28 + $0xa4] ss:$16 sps:$4 sm:$0xff]  }
 0x219   : > { %1828 = vmatprep.subr.bf16.mxu0 %v5325_v51  ;;  %1865 = vmatprep.subr.bf16.mxu1 %v5328_v52  ;;  %v5397_v51 = vld [vmem:[%s6539_s28 + $0xa8] ss:$16 sps:$4 sm:$0xff]   ;;  %v5400_v52 = vld [vmem:[%s6539_s28 + $0xa0] ss:$16 sps:$4 sm:$0xff]  }
 0x21c   : > { %1829 = vmatpush1.bf16.msra.mxu0 %v5323_v53  ;;  %1866 = vmatpush1.bf16.msra.mxu1 %v5326_v55  ;;  %v5405_v53 = vld [vmem:[%s6539_s28 + $0xcc] ss:$16 sps:$4 sm:$0xff]   ;;  %v5408_v55 = vld [vmem:[%s6539_s28 + $0xc4] ss:$16 sps:$4 sm:$0xff]  }
 0x21d   : > { %1867 = vmatprep.subr.bf16.mxu1 %v5331_v56  ;;  %4967 = vmatprep.subr.mxu0 %v6135_v1  ;;  %v5403_v56 = vld [vmem:[%s6539_s28 + $0xc8] ss:$16 sps:$4 sm:$0xff]  }
 0x21f   : > { %1831 = vmatmul.mubr.bf16.vlgmr.msra.gmra.mrb[8].mxu0 %v6598_v49 }
 0x220   : > { %1868 = vmatpush1.bf16.msra.mxu1 %v5329_v57  ;;  %4968 = vmatpush3.msk.msra.mxu0 %vm925_vm3, %v1944_v59  ;;  %v5406_v57 = vld [vmem:[%s6539_s28 + $0xc0] ss:$16 sps:$4 sm:$0xff]   ;;  %v5414_v59 = vld [vmem:[%s6539_s28 + $0xe4] ss:$16 sps:$4 sm:$0xff]  }
 0x221   : > { %1869 = vmatprep.subr.bf16.mxu1 %v5334_v58  ;;  %4969 = vmatprep.mubr.msk.f32.mxu0 %vm6137_vm8, %v6135_v1  ;;  %v5341_v1 = vld [vmem:[%s6532_s11 + $0x88] sm:$0xff]  }
 0x222   : > { %4945 = vmatprep.subr.bf16.mxu0 %v5335_v60  ;;  %v5411_v58 = vld [vmem:[%s6539_s28 + $0xec] ss:$16 sps:$4 sm:$0xff]   ;;  %v5409_v60 = vld [vmem:[%s6539_s28 + $0xe8] ss:$16 sps:$4 sm:$0xff]  }
 0x224   : > { %1870 = vmatpush1.bf16.msra.mxu1 %v5332_v61  ;;  %v5412_v61 = vld [vmem:[%s6539_s28 + $0xe0] ss:$16 sps:$4 sm:$0xff]  }
 0x225   : > { %4923 = vmatprep.subr.bf16.mxu1 %v5336_v62  ;;  %v5417_v62 = vld [vmem:[%s6539_s28 + $0x10c] ss:$16 sps:$4 sm:$0xff]  }
 0x227   : > { %1872 = vmatmul.mubr.bf16.vlgmr.msra.gmra.mrb[12].mxu1 %v6604_v33  ;;  %4970 = vmatmul.mubr.msk.f32.vlgmr.msra.gmra.mrb[2].mxu0 %vm921_vm6, %v6582_v48  ;;  %v5345_v48 = vld [vmem:[%s6532_s11 + $0x90] sm:$0xff]  }
 0x228   : > { %4946 = vmatpush3.bf16.msra.mxu0 %v5337_v63  ;;  %4924 = vmatpush3.bf16.msra.mxu1 %v5338_v0  ;;  %v5420_v63 = vld [vmem:[%s6539_s28 + $0x104] ss:$16 sps:$4 sm:$0xff]   ;;  %v5415_v0 = vld [vmem:[%s6539_s28 + $0x108] ss:$16 sps:$4 sm:$0xff]  }
 0x229   : > { %4947 = vmatprep.subr.bf16.mxu0 %v5339_v2  ;;  %4925 = vmatprep.subr.bf16.mxu1 %v5340_v3  ;;  %v5418_v2 = vld [vmem:[%s6539_s28 + $0x100] ss:$16 sps:$4 sm:$0xff]   ;;  %v5423_v3 = vld [vmem:[%s6539_s28 + $0x12c] ss:$16 sps:$4 sm:$0xff]  }
 0x22a   : > { %2242 = vmatprep.mubr.bf16.mxu1 %v6574_v43  ;;  %2282 = vmatprep.mubr.bf16.mxu0 %v6591_v54  ;;  %v5350_v43 = vld [vmem:[%s6532_s11 + $0x18] sm:$0xff]   ;;  %v5351_v54 = vld [vmem:[%s6532_s11 + $0xe0] sm:$0xff]   ;;  %s6138_s11 = smov [#allocation17]  }
 0x22b   : > { %s6003_s19 = sshll.u32 %s6138_s11, 4  ;;  %s6004_s19 = int_to_ptr.vmem [resolvable:$false] %s6003_s19 }
 0x22c   : > { %4948 = vmatpush3.bf16.msra.mxu0 %v5341_v1  ;;  %4926 = vmatpush3.bf16.msra.mxu1 %v5342_v44  ;;  %v5426_v1 = vld [vmem:[%s6539_s28 + $0x124] ss:$16 sps:$4 sm:$0xff]   ;;  %v5421_v44 = vld [vmem:[%s6539_s28 + $0x128] ss:$16 sps:$4 sm:$0xff]   ;;  %p6006_p0 = scmp.lt.s32.totalorder %s6951_s0, %s6004_s19 }
 0x22d   : > { %4949 = vmatprep.subr.bf16.mxu0 %v5343_v4  ;;  %4927 = vmatprep.subr.bf16.mxu1 %v5344_v5  ;;  %v5424_v4 = vld [vmem:[%s6539_s28 + $0x120] ss:$16 sps:$4 sm:$0xff]   ;;  %v5429_v5 = vld [vmem:[%s6539_s28 + $0x14c] ss:$16 sps:$4 sm:$0xff]  }
 0x230   : > { %4950 = vmatpush3.bf16.msra.mxu0 %v5345_v48  ;;  %4928 = vmatpush3.bf16.msra.mxu1 %v5346_v6  ;;  %v5432_v48 = vld [vmem:[%s6539_s28 + $0x144] ss:$16 sps:$4 sm:$0xff]   ;;  %v5427_v6 = vld [vmem:[%s6539_s28 + $0x148] ss:$16 sps:$4 sm:$0xff]  }
 0x231   : > { %4951 = vmatprep.subr.bf16.mxu0 %v5347_v7  ;;  %4929 = vmatprep.subr.bf16.mxu1 %v5348_v8  ;;  %v5430_v7 = vld [vmem:[%s6539_s28 + $0x140] ss:$16 sps:$4 sm:$0xff]   ;;  %v5435_v8 = vld [vmem:[%s6539_s28 + $0x16c] ss:$16 sps:$4 sm:$0xff]  }
 0x234   : > { %4952 = vmatpush3.bf16.msra.mxu0 %v5349_v9  ;;  %4930 = vmatpush3.bf16.msra.mxu1 %v5350_v43  ;;  %v5438_v9 = vld [vmem:[%s6539_s28 + $0x164] ss:$16 sps:$4 sm:$0xff]   ;;  %v5433_v43 = vld [vmem:[%s6539_s28 + $0x168] ss:$16 sps:$4 sm:$0xff]  }
 0x235   : > { %4953 = vmatprep.subr.bf16.mxu0 %v5351_v54  ;;  %4931 = vmatprep.subr.bf16.mxu1 %v5352_v10  ;;  %v5436_v54 = vld [vmem:[%s6539_s28 + $0x160] ss:$16 sps:$4 sm:$0xff]   ;;  %v5441_v10 = vld [vmem:[%s6539_s28 + $0x18c] ss:$16 sps:$4 sm:$0xff]  }
 0x238   : > { %4954 = vmatpush3.bf16.msra.mxu0 %v5353_v11  ;;  %4932 = vmatpush3.bf16.msra.mxu1 %v5354_v12  ;;  %v5444_v11 = vld [vmem:[%s6539_s28 + $0x184] ss:$16 sps:$4 sm:$0xff]  }
 0x239   : > { %4955 = vmatprep.subr.bf16.mxu0 %v5355_v13  ;;  %4933 = vmatprep.subr.bf16.mxu1 %v5356_v14 }
 0x23c   : > { %4956 = vmatpush3.bf16.msra.mxu0 %v5357_v15  ;;  %4934 = vmatpush3.bf16.msra.mxu1 %v5358_v16 }
 0x23d   : > { %4957 = vmatprep.subr.bf16.mxu0 %v5359_v17  ;;  %4935 = vmatprep.subr.bf16.mxu1 %v5360_v18  ;;  %v5439_v17 = vld [vmem:[%s6539_s28 + $0x188] ss:$16 sps:$4 sm:$0xff]   ;;  %v5442_v18 = vld [vmem:[%s6539_s28 + $0x180] ss:$16 sps:$4 sm:$0xff]  }
 0x240   : > { %4958 = vmatpush3.bf16.msra.mxu0 %v5361_v19  ;;  %4936 = vmatpush3.bf16.msra.mxu1 %v5362_v20  ;;  %v5447_v19 = vld [vmem:[%s6539_s28 + $0x1ac] ss:$16 sps:$4 sm:$0xff]   ;;  %v5450_v20 = vld [vmem:[%s6539_s28 + $0x1a4] ss:$16 sps:$4 sm:$0xff]  }
 0x241   : > { %4959 = vmatprep.subr.bf16.mxu0 %v5363_v21  ;;  %4937 = vmatprep.subr.bf16.mxu1 %v5364_v22 }
 0x244   : > { %4960 = vmatpush3.bf16.msra.mxu0 %v5365_v23  ;;  %4938 = vmatpush3.bf16.msra.mxu1 %v5366_v24  ;;  %v5445_v23 = vld [vmem:[%s6539_s28 + $0x1a8] ss:$16 sps:$4 sm:$0xff]   ;;  %v5448_v24 = vld [vmem:[%s6539_s28 + $0x1a0] ss:$16 sps:$4 sm:$0xff]  }
 0x245   : > { %4020 = vmatprep.subr.bf16.mxu0 %v5369_v25  ;;  %3856 = vmatprep.subr.bf16.mxu1 %v5372_v26  ;;  %v5453_v25 = vld [vmem:[%s6539_s28 + $0x1cc] ss:$16 sps:$4 sm:$0xff]   ;;  %v5456_v26 = vld [vmem:[%s6539_s28 + $0x1c4] ss:$16 sps:$4 sm:$0xff]  }
 0x247   : > { %2243 = vmatmul.mubr.bf16.vlgmr.msra.gmra.mrb[16].mxu1 %v6598_v49  ;;  %2283 = vmatmul.mubr.bf16.vlgmr.msra.gmra.mrb[12].mxu0 %v6604_v33  ;;  %v5382_v49 = vld [vmem:[%s6539_s28 + $0x40] ss:$16 sps:$4 sm:$0xff]   ;;  %v5387_v33 = vld [vmem:[%s6539_s28 + $0x6c] ss:$16 sps:$4 sm:$0xff]  }
 0x248   : > { %4021 = vmatpush1.bf16.msra.mxu0 %v5367_v27  ;;  %3857 = vmatpush1.bf16.msra.mxu1 %v5370_v28 }
 0x249   : > { %4022 = vmatprep.subr.bf16.mxu0 %v5375_v29  ;;  %3858 = vmatprep.subr.bf16.mxu1 %v5378_v30  ;;  %v5451_v29 = vld [vmem:[%s6539_s28 + $0x1c8] ss:$16 sps:$4 sm:$0xff]   ;;  %v5454_v30 = vld [vmem:[%s6539_s28 + $0x1c0] ss:$16 sps:$4 sm:$0xff]  }
 0x24c   : > { %4023 = vmatpush1.bf16.msra.mxu0 %v5373_v31  ;;  %3859 = vmatpush1.bf16.msra.mxu1 %v5376_v34  ;;  %v5459_v31 = vld [vmem:[%s6539_s28 + $0x1ec] ss:$16 sps:$4 sm:$0xff]   ;;  %v5462_v34 = vld [vmem:[%s6539_s28 + $0x1e4] ss:$16 sps:$4 sm:$0xff]  }
 0x24d   : > { %4024 = vmatprep.subr.bf16.mxu0 %v5381_v35  ;;  %3860 = vmatprep.subr.bf16.mxu1 %v5384_v36  ;;  %v5457_v35 = vld [vmem:[%s6539_s28 + $0x1e8] ss:$16 sps:$4 sm:$0xff]   ;;  %v5460_v36 = vld [vmem:[%s6539_s28 + $0x1e0] ss:$16 sps:$4 sm:$0xff]  }
 0x250   : > { %4025 = vmatpush1.bf16.msra.mxu0 %v5379_v37  ;;  %3861 = vmatpush1.bf16.msra.mxu1 %v5382_v49  ;;  %v5465_v37 = vld [vmem:[%s6539_s28 + $0x20c] ss:$16 sps:$4 sm:$0xff]   ;;  %v5468_v49 = vld [vmem:[%s6539_s28 + $0x204] ss:$16 sps:$4 sm:$0xff]  }
 0x251   : > { %4026 = vmatprep.subr.bf16.mxu0 %v5387_v33  ;;  %3862 = vmatprep.subr.bf16.mxu1 %v5390_v38  ;;  %v5463_v33 = vld [vmem:[%s6539_s28 + $0x208] ss:$16 sps:$4 sm:$0xff]  }
 0x254   : > { %4027 = vmatpush1.bf16.msra.mxu0 %v5385_v39  ;;  %3863 = vmatpush1.bf16.msra.mxu1 %v5388_v40  ;;  %v5466_v39 = vld [vmem:[%s6539_s28 + $0x200] ss:$16 sps:$4 sm:$0xff]  }
 0x255   : > { %4028 = vmatprep.subr.bf16.mxu0 %v5393_v41  ;;  %3864 = vmatprep.subr.bf16.mxu1 %v5396_v42  ;;  %v5471_v41 = vld [vmem:[%s6539_s28 + $0x22c] ss:$16 sps:$4 sm:$0xff]   ;;  %v5474_v42 = vld [vmem:[%s6539_s28 + $0x224] ss:$16 sps:$4 sm:$0xff]  }
 0x258   : > { %4029 = vmatpush1.bf16.msra.mxu0 %v5391_v45  ;;  %3865 = vmatpush1.bf16.msra.mxu1 %v5394_v46  ;;  %v5469_v45 = vld [vmem:[%s6539_s28 + $0x228] ss:$16 sps:$4 sm:$0xff]   ;;  %v5472_v46 = vld [vmem:[%s6539_s28 + $0x220] ss:$16 sps:$4 sm:$0xff]  }
 0x259   : > { %4030 = vmatprep.subr.bf16.mxu0 %v5399_v47  ;;  %3866 = vmatprep.subr.bf16.mxu1 %v5402_v50  ;;  %v5477_v47 = vld [vmem:[%s6539_s28 + $0x24c] ss:$16 sps:$4 sm:$0xff]   ;;  %v5480_v50 = vld [vmem:[%s6539_s28 + $0x244] ss:$16 sps:$4 sm:$0xff]  }
 0x25c   : > { %4031 = vmatpush1.bf16.msra.mxu0 %v5397_v51  ;;  %3867 = vmatpush1.bf16.msra.mxu1 %v5400_v52  ;;  %v5475_v51 = vld [vmem:[%s6539_s28 + $0x248] ss:$16 sps:$4 sm:$0xff]   ;;  %v5478_v52 = vld [vmem:[%s6539_s28 + $0x240] ss:$16 sps:$4 sm:$0xff]  }
 0x25d   : > { %4032 = vmatprep.subr.bf16.mxu0 %v5405_v53  ;;  %3868 = vmatprep.subr.bf16.mxu1 %v5408_v55  ;;  %v5483_v53 = vld [vmem:[%s6539_s28 + $0x26c] ss:$16 sps:$4 sm:$0xff]   ;;  %v5486_v55 = vld [vmem:[%s6539_s28 + $0x264] ss:$16 sps:$4 sm:$0xff]  }
 0x260   : > { %4033 = vmatpush1.bf16.msra.mxu0 %v5403_v56  ;;  %3869 = vmatpush1.bf16.msra.mxu1 %v5406_v57  ;;  %v5481_v56 = vld [vmem:[%s6539_s28 + $0x268] ss:$16 sps:$4 sm:$0xff]   ;;  %v5484_v57 = vld [vmem:[%s6539_s28 + $0x260] ss:$16 sps:$4 sm:$0xff]  }
 0x261   : > { %4034 = vmatprep.subr.bf16.mxu0 %v5411_v58  ;;  %3870 = vmatprep.subr.bf16.mxu1 %v5414_v59  ;;  %v5489_v58 = vld [vmem:[%s6539_s28 + $0x28c] ss:$16 sps:$4 sm:$0xff]   ;;  %v5492_v59 = vld [vmem:[%s6539_s28 + $0x284] ss:$16 sps:$4 sm:$0xff]  }
 0x264   : > { %4035 = vmatpush1.bf16.msra.mxu0 %v5409_v60  ;;  %3871 = vmatpush1.bf16.msra.mxu1 %v5412_v61  ;;  %v5487_v60 = vld [vmem:[%s6539_s28 + $0x288] ss:$16 sps:$4 sm:$0xff]   ;;  %v5490_v61 = vld [vmem:[%s6539_s28 + $0x280] ss:$16 sps:$4 sm:$0xff]  }
 0x265   : > { %4036 = vmatprep.subr.bf16.mxu0 %v5417_v62  ;;  %3872 = vmatprep.subr.bf16.mxu1 %v5420_v63  ;;  %v5495_v62 = vld [vmem:[%s6539_s28 + $0x2ac] ss:$16 sps:$4 sm:$0xff]   ;;  %v5498_v63 = vld [vmem:[%s6539_s28 + $0x2a4] ss:$16 sps:$4 sm:$0xff]  }
 0x268   : > { %4037 = vmatpush1.bf16.msra.mxu0 %v5415_v0  ;;  %3873 = vmatpush1.bf16.msra.mxu1 %v5418_v2  ;;  %v5493_v0 = vld [vmem:[%s6539_s28 + $0x2a8] ss:$16 sps:$4 sm:$0xff]   ;;  %v5496_v2 = vld [vmem:[%s6539_s28 + $0x2a0] ss:$16 sps:$4 sm:$0xff]  }
 0x269   : > { %4038 = vmatprep.subr.bf16.mxu0 %v5423_v3  ;;  %3874 = vmatprep.subr.bf16.mxu1 %v5426_v1  ;;  %v5501_v3 = vld [vmem:[%s6539_s28 + $0x2cc] ss:$16 sps:$4 sm:$0xff]   ;;  %v5504_v1 = vld [vmem:[%s6539_s28 + $0x2c4] ss:$16 sps:$4 sm:$0xff]  }
 0x26c   : > { %4039 = vmatpush1.bf16.msra.mxu0 %v5421_v44  ;;  %3875 = vmatpush1.bf16.msra.mxu1 %v5424_v4  ;;  %v5499_v44 = vld [vmem:[%s6539_s28 + $0x2c8] ss:$16 sps:$4 sm:$0xff]   ;;  %v5502_v4 = vld [vmem:[%s6539_s28 + $0x2c0] ss:$16 sps:$4 sm:$0xff]  }
 0x26d   : > { %4040 = vmatprep.subr.bf16.mxu0 %v5429_v5  ;;  %3876 = vmatprep.subr.bf16.mxu1 %v5432_v48  ;;  %v5507_v5 = vld [vmem:[%s6539_s28 + $0x2ec] ss:$16 sps:$4 sm:$0xff]   ;;  %v5510_v48 = vld [vmem:[%s6539_s28 + $0x2e4] ss:$16 sps:$4 sm:$0xff]  }
 0x270   : > { %4041 = vmatpush1.bf16.msra.mxu0 %v5427_v6  ;;  %3877 = vmatpush1.bf16.msra.mxu1 %v5430_v7  ;;  %v5505_v6 = vld [vmem:[%s6539_s28 + $0x2e8] ss:$16 sps:$4 sm:$0xff]   ;;  %v5508_v7 = vld [vmem:[%s6539_s28 + $0x2e0] ss:$16 sps:$4 sm:$0xff]  }
 0x271   : > { %4042 = vmatprep.subr.bf16.mxu0 %v5435_v8  ;;  %3878 = vmatprep.subr.bf16.mxu1 %v5438_v9  ;;  %v5513_v8 = vld [vmem:[%s6539_s28 + $0x30c] ss:$16 sps:$4 sm:$0xff]   ;;  %v5516_v9 = vld [vmem:[%s6539_s28 + $0x304] ss:$16 sps:$4 sm:$0xff]  }
 0x272   : > { %v699_v12 = vpop.f32.mrb[0].mxu0  ;;  %v6703_v13 = vpop.f32.mrb[0].mxu1 }
 0x273   : > { %v701_v14 = vpop.f32.mrb[1].mxu0  ;;  %v772_v15 = vpop.f32.mrb[1].mxu1  ;;  %v2290_v38 = vpack.c.bf16 %v699_v12, %v699_v12  ;;  %v5517_v12 = vld [vmem:[%s6539_s28 + $0x328] ss:$16 sps:$4 sm:$0xff]  }
 0x274   : > { %4043 = vmatpush1.bf16.msra.mxu0 %v5433_v43  ;;  %v2291_v16 = vpack.c.bf16 %v701_v14, %v701_v14  ;;  %3879 = vmatpush1.bf16.msra.mxu1 %v5436_v54  ;;  %v2293_v40 = vpack.c.bf16 %v772_v15, %v772_v15  ;;  %v5511_v43 = vld [vmem:[%s6539_s28 + $0x308] ss:$16 sps:$4 sm:$0xff]   ;;  %v5514_v54 = vld [vmem:[%s6539_s28 + $0x300] ss:$16 sps:$4 sm:$0xff]   ;;  %v5525_v15 = vld [vmem:[%s6539_s28 + $0x34c] ss:$16 sps:$4 sm:$0xff]  }
 0x275   : > { %4044 = vmatprep.subr.bf16.mxu0 %v5441_v10  ;;  %3880 = vmatprep.subr.bf16.mxu1 %v5444_v11  ;;  %v5519_v10 = vld [vmem:[%s6539_s28 + $0x32c] ss:$16 sps:$4 sm:$0xff]   ;;  %v5522_v11 = vld [vmem:[%s6539_s28 + $0x324] ss:$16 sps:$4 sm:$0xff]   ;;  %v5520_v14 = vld [vmem:[%s6539_s28 + $0x320] ss:$16 sps:$4 sm:$0xff]  }
 0x276   : > { %v6709_v21 = vpop.f32.mrb[2].mxu1  ;;  %3888 = vmatprep.mubr.bf16.mxu1 %v2291_v16  ;;  %4052 = vmatprep.mubr.bf16.mxu0 %v2291_v16  ;;  %v5528_v16 = vld [vmem:[%s6539_s28 + $0x344] ss:$16 sps:$4 sm:$0xff]  }
 0x277   : > { %v6711_v22 = vpop.f32.mrb[3].mxu1 }
 0x278   : > { %4045 = vmatpush1.bf16.msra.mxu0 %v5439_v17  ;;  %3881 = vmatpush1.bf16.msra.mxu1 %v5442_v18  ;;  %v5523_v17 = vld [vmem:[%s6539_s28 + $0x348] ss:$16 sps:$4 sm:$0xff]   ;;  %v5526_v18 = vld [vmem:[%s6539_s28 + $0x340] ss:$16 sps:$4 sm:$0xff]  }
 0x279   : > { %4046 = vmatprep.subr.bf16.mxu0 %v5447_v19  ;;  %3882 = vmatprep.subr.bf16.mxu1 %v5450_v20  ;;  %v5531_v19 = vld [vmem:[%s6539_s28 + $0x36c] ss:$16 sps:$4 sm:$0xff]   ;;  %v5534_v20 = vld [vmem:[%s6539_s28 + $0x364] ss:$16 sps:$4 sm:$0xff]  }
 0x27a   : > { %v6717_v27 = vpop.f32.mrb[4].mxu1 }
 0x27b   : > { %v6719_v28 = vpop.f32.mrb[5].mxu1 }
 0x27c   : > { %4047 = vmatpush1.bf16.msra.mxu0 %v5445_v23  ;;  %3883 = vmatpush1.bf16.msra.mxu1 %v5448_v24  ;;  %v5529_v23 = vld [vmem:[%s6539_s28 + $0x368] ss:$16 sps:$4 sm:$0xff]   ;;  %v5532_v24 = vld [vmem:[%s6539_s28 + $0x360] ss:$16 sps:$4 sm:$0xff]  }
 0x27d   : > { %4048 = vmatprep.subr.bf16.mxu0 %v5453_v25  ;;  %3884 = vmatprep.subr.bf16.mxu1 %v5456_v26  ;;  %v5537_v25 = vld [vmem:[%s6539_s28 + $0x38c] ss:$16 sps:$4 sm:$0xff]  }
 0x280   : > { %4049 = vmatpush1.bf16.msra.mxu0 %v5451_v29  ;;  %3885 = vmatpush1.bf16.msra.mxu1 %v5454_v30  ;;  %v5540_v29 = vld [vmem:[%s6539_s28 + $0x384] ss:$16 sps:$4 sm:$0xff]  }
 0x281   : > { %4050 = vmatprep.subr.bf16.mxu0 %v5459_v31  ;;  %3886 = vmatprep.subr.bf16.mxu1 %v5462_v34 }
 0x284   : > { %4051 = vmatpush1.bf16.msra.mxu0 %v5457_v35  ;;  %3887 = vmatpush1.bf16.msra.mxu1 %v5460_v36  ;;  %v5535_v35 = vld [vmem:[%s6539_s28 + $0x388] ss:$16 sps:$4 sm:$0xff]  }
 0x285   : > { %4061 = vmatprep.subr.bf16.mxu0 %v5465_v37  ;;  %3897 = vmatprep.subr.bf16.mxu1 %v5468_v49  ;;  %v5538_v37 = vld [vmem:[%s6539_s28 + $0x380] ss:$16 sps:$4 sm:$0xff]   ;;  %v5543_v49 = vld [vmem:[%s6539_s28 + $0x3ac] ss:$16 sps:$4 sm:$0xff]  }
 0x287   : > { %4053 = vmatmul.mubr.bf16.vlgmr.msra.gmra.mrb[16].mxu0 %v2290_v38  ;;  %3889 = vmatmul.mubr.bf16.vlgmr.msra.gmra.mrb[20].mxu1 %v2290_v38  ;;  %v5546_v38 = vld [vmem:[%s6539_s28 + $0x3a4] ss:$16 sps:$4 sm:$0xff]  }
 0x288   : > { %4062 = vmatpush1.bf16.msra.mxu0 %v5463_v33  ;;  %4093 = vmatprep.mubr.bf16.mxu0 %v2293_v40 }
 0x289   : > { %3898 = vmatpush1.bf16.msra.mxu1 %v5466_v39  ;;  %3929 = vmatprep.mubr.bf16.mxu1 %v2293_v40  ;;  %v5541_v39 = vld [vmem:[%s6539_s28 + $0x3a8] ss:$16 sps:$4 sm:$0xff]  }
 0x28a   : > { %4063 = vmatprep.subr.bf16.mxu0 %v5471_v41  ;;  %3899 = vmatprep.subr.bf16.mxu1 %v5474_v42  ;;  %v5552_v41 = vld [vmem:[%s6539_s28 + $0x3c4] ss:$16 sps:$4 sm:$0xff]  }
 0x28c   : > { %4064 = vmatpush1.bf16.msra.mxu0 %v5469_v45 }
 0x28d   : > { %3900 = vmatpush1.bf16.msra.mxu1 %v5472_v46  ;;  %4065 = vmatprep.subr.bf16.mxu0 %v5477_v47 }
 0x28e   : > { %3901 = vmatprep.subr.bf16.mxu1 %v5480_v50  ;;  %v5547_v50 = vld [vmem:[%s6539_s28 + $0x3c8] ss:$16 sps:$4 sm:$0xff]  }
 0x290   : > { %4066 = vmatpush1.bf16.msra.mxu0 %v5475_v51 }
 0x291   : > { %3902 = vmatpush1.bf16.msra.mxu1 %v5478_v52  ;;  %4067 = vmatprep.subr.bf16.mxu0 %v5483_v53  ;;  %v5550_v52 = vld [vmem:[%s6539_s28 + $0x3c0] ss:$16 sps:$4 sm:$0xff]   ;;  %v5555_v53 = vld [vmem:[%s6539_s28 + $0x3ec] ss:$16 sps:$4 sm:$0xff]  }
 0x292   : > { %3903 = vmatprep.subr.bf16.mxu1 %v5486_v55  ;;  %v5558_v55 = vld [vmem:[%s6539_s28 + $0x3e4] ss:$16 sps:$4 sm:$0xff]  }
 0x294   : > { %4068 = vmatpush1.bf16.msra.mxu0 %v5481_v56  ;;  %v5553_v56 = vld [vmem:[%s6539_s28 + $0x3e8] ss:$16 sps:$4 sm:$0xff]  }
 0x295   : > { %3904 = vmatpush1.bf16.msra.mxu1 %v5484_v57  ;;  %4069 = vmatprep.subr.bf16.mxu0 %v5489_v58  ;;  %v5556_v57 = vld [vmem:[%s6539_s28 + $0x3e0] ss:$16 sps:$4 sm:$0xff]   ;;  %v5561_v58 = vld [vmem:[%s6539_s28 + $0x40c] ss:$16 sps:$4 sm:$0xff]  }
 0x296   : > { %3905 = vmatprep.subr.bf16.mxu1 %v5492_v59  ;;  %v5564_v59 = vld [vmem:[%s6539_s28 + $0x404] ss:$16 sps:$4 sm:$0xff]  }
 0x298   : > { %4070 = vmatpush1.bf16.msra.mxu0 %v5487_v60  ;;  %v5559_v60 = vld [vmem:[%s6539_s28 + $0x408] ss:$16 sps:$4 sm:$0xff]  }
 0x299   : > { %3906 = vmatpush1.bf16.msra.mxu1 %v5490_v61  ;;  %4071 = vmatprep.subr.bf16.mxu0 %v5495_v62  ;;  %v2292_v61 = vpack.c.bf16 %v6703_v13, %v6703_v13  ;;  %v5562_v62 = vld [vmem:[%s6539_s28 + $0x400] ss:$16 sps:$4 sm:$0xff]  }
 0x29a   : > { %3907 = vmatprep.subr.bf16.mxu1 %v5498_v63  ;;  %v5567_v63 = vld [vmem:[%s6539_s28 + $0x42c] ss:$16 sps:$4 sm:$0xff]   ;;  %v5568_v13 = vld [vmem:[%s6539_s28 + $0x420] ss:$16 sps:$4 sm:$0xff]  }
 0x29c   : > { %4072 = vmatpush1.bf16.msra.mxu0 %v5493_v0 }
 0x29d   : > { %3908 = vmatpush1.bf16.msra.mxu1 %v5496_v2  ;;  %4073 = vmatprep.subr.bf16.mxu0 %v5501_v3  ;;  %v5570_v2 = vld [vmem:[%s6539_s28 + $0x424] ss:$16 sps:$4 sm:$0xff]   ;;  %v5565_v3 = vld [vmem:[%s6539_s28 + $0x428] ss:$16 sps:$4 sm:$0xff]  }
 0x29e   : > { %3909 = vmatprep.subr.bf16.mxu1 %v5504_v1  ;;  %v5573_v1 = vld [vmem:[%s6539_s28 + $0x44c] ss:$16 sps:$4 sm:$0xff]  }
 0x2a0   : > { %4074 = vmatpush1.bf16.msra.mxu0 %v5499_v44  ;;  %v5576_v44 = vld [vmem:[%s6539_s28 + $0x444] ss:$16 sps:$4 sm:$0xff]  }
 0x2a1   : > { %3910 = vmatpush1.bf16.msra.mxu1 %v5502_v4  ;;  %4075 = vmatprep.subr.bf16.mxu0 %v5507_v5  ;;  %v5571_v4 = vld [vmem:[%s6539_s28 + $0x448] ss:$16 sps:$4 sm:$0xff]   ;;  %v5574_v5 = vld [vmem:[%s6539_s28 + $0x440] ss:$16 sps:$4 sm:$0xff]  }
 0x2a2   : > { %3911 = vmatprep.subr.bf16.mxu1 %v5510_v48  ;;  %v5579_v48 = vld [vmem:[%s6539_s28 + $0x46c] ss:$16 sps:$4 sm:$0xff]  }
 0x2a4   : > { %4076 = vmatpush1.bf16.msra.mxu0 %v5505_v6  ;;  %v5582_v6 = vld [vmem:[%s6539_s28 + $0x464] ss:$16 sps:$4 sm:$0xff]  }
 0x2a5   : > { %3912 = vmatpush1.bf16.msra.mxu1 %v5508_v7  ;;  %4077 = vmatprep.subr.bf16.mxu0 %v5513_v8  ;;  %v5577_v7 = vld [vmem:[%s6539_s28 + $0x468] ss:$16 sps:$4 sm:$0xff]   ;;  %v5580_v8 = vld [vmem:[%s6539_s28 + $0x460] ss:$16 sps:$4 sm:$0xff]  }
 0x2a6   : > { %3913 = vmatprep.subr.bf16.mxu1 %v5516_v9  ;;  %v5585_v9 = vld [vmem:[%s6539_s28 + $0x48c] ss:$16 sps:$4 sm:$0xff]  }
 0x2a8   : > { %4078 = vmatpush1.bf16.msra.mxu0 %v5511_v43  ;;  %v5588_v43 = vld [vmem:[%s6539_s28 + $0x484] ss:$16 sps:$4 sm:$0xff]  }
 0x2a9   : > { %3914 = vmatpush1.bf16.msra.mxu1 %v5514_v54  ;;  %4079 = vmatprep.subr.bf16.mxu0 %v5519_v10  ;;  %v5583_v54 = vld [vmem:[%s6539_s28 + $0x488] ss:$16 sps:$4 sm:$0xff]   ;;  %v5586_v10 = vld [vmem:[%s6539_s28 + $0x480] ss:$16 sps:$4 sm:$0xff]  }
 0x2aa   : > { %3915 = vmatprep.subr.bf16.mxu1 %v5522_v11  ;;  %v5591_v11 = vld [vmem:[%s6539_s28 + $0x4ac] ss:$16 sps:$4 sm:$0xff]  }
 0x2ac   : > { %4080 = vmatpush1.bf16.msra.mxu0 %v5517_v12  ;;  %v5594_v12 = vld [vmem:[%s6539_s28 + $0x4a4] ss:$16 sps:$4 sm:$0xff]  }
 0x2ad   : > { %3916 = vmatpush1.bf16.msra.mxu1 %v5520_v14  ;;  %4081 = vmatprep.subr.bf16.mxu0 %v5525_v15  ;;  %v5589_v14 = vld [vmem:[%s6539_s28 + $0x4a8] ss:$16 sps:$4 sm:$0xff]   ;;  %v5592_v15 = vld [vmem:[%s6539_s28 + $0x4a0] ss:$16 sps:$4 sm:$0xff]  }
 0x2ae   : > { %3917 = vmatprep.subr.bf16.mxu1 %v5528_v16  ;;  %v5597_v16 = vld [vmem:[%s6539_s28 + $0x4cc] ss:$16 sps:$4 sm:$0xff]  }
 0x2b0   : > { %4082 = vmatpush1.bf16.msra.mxu0 %v5523_v17  ;;  %v5600_v17 = vld [vmem:[%s6539_s28 + $0x4c4] ss:$16 sps:$4 sm:$0xff]  }
 0x2b1   : > { %3918 = vmatpush1.bf16.msra.mxu1 %v5526_v18  ;;  %4083 = vmatprep.subr.bf16.mxu0 %v5531_v19  ;;  %v5595_v18 = vld [vmem:[%s6539_s28 + $0x4c8] ss:$16 sps:$4 sm:$0xff]   ;;  %v5598_v19 = vld [vmem:[%s6539_s28 + $0x4c0] ss:$16 sps:$4 sm:$0xff]  }
 0x2b2   : > { %v1750_v26 = vpop.f32.mrb[4].mxu0  ;;  %3919 = vmatprep.subr.bf16.mxu1 %v5534_v20  ;;  %v5603_v20 = vld [vmem:[%s6539_s28 + $0x4ec] ss:$16 sps:$4 sm:$0xff]  }
 0x2b3   : > { %v1751_v30 = vadd.f32 %v1750_v26, %v6709_v21  ;;  %v1752_v31 = vpop.f32.mrb[5].mxu0  ;;  %v5544_v21 = vld [vmem:[%s6539_s28 + $0x3a0] ss:$16 sps:$4 sm:$0xff]   ;;  %v5609_v26 = vld [vmem:[%s6539_s28 + $0x50c] ss:$16 sps:$4 sm:$0xff]  }
 0x2b4   : > { %v1753_v34 = vadd.f32 %v1752_v31, %v6711_v22  ;;  %4084 = vmatpush1.bf16.msra.mxu0 %v5529_v23  ;;  %v1754_v36 = vpop.f32.mrb[6].mxu0  ;;  %v5549_v22 = vld [vmem:[%s6539_s28 + $0x3cc] ss:$16 sps:$4 sm:$0xff]   ;;  %v5606_v23 = vld [vmem:[%s6539_s28 + $0x4e4] ss:$16 sps:$4 sm:$0xff]  }
 0x2b5   : > { %3920 = vmatpush1.bf16.msra.mxu1 %v5532_v24  ;;  %4085 = vmatprep.subr.bf16.mxu0 %v5537_v25  ;;  %v1755_v33 = vpop.f32.mrb[7].mxu0  ;;  %v5601_v24 = vld [vmem:[%s6539_s28 + $0x4e8] ss:$16 sps:$4 sm:$0xff]   ;;  %v5604_v25 = vld [vmem:[%s6539_s28 + $0x4e0] ss:$16 sps:$4 sm:$0xff]  }
 0x2b6   : > { %3921 = vmatprep.subr.bf16.mxu1 %v5540_v29  ;;  %v5612_v29 = vld [vmem:[%s6539_s28 + $0x504] ss:$16 sps:$4 sm:$0xff]   ;;  %v5610_v31 = vld [vmem:[%s6539_s28 + $0x500] ss:$16 sps:$4 sm:$0xff]   ;;  %v5613_v36 = vld [vmem:[%s6539_s28 + $0x528] ss:$16 sps:$4 sm:$0xff]  }
 0x2b7   : > { %v5624_v33 = vld [vmem:[%s6539_s28 + $0x544] ss:$16 sps:$4 sm:$0xff]  }
 0x2b8   : > { %4086 = vmatpush1.bf16.msra.mxu0 %v5535_v35  ;;  %v5618_v35 = vld [vmem:[%s6539_s28 + $0x524] ss:$16 sps:$4 sm:$0xff]  }
 0x2b9   : > { %3922 = vmatpush1.bf16.msra.mxu1 %v5538_v37  ;;  %4087 = vmatprep.subr.bf16.mxu0 %v5543_v49  ;;  %v5616_v37 = vld [vmem:[%s6539_s28 + $0x520] ss:$16 sps:$4 sm:$0xff]   ;;  %v5621_v49 = vld [vmem:[%s6539_s28 + $0x54c] ss:$16 sps:$4 sm:$0xff]  }
 0x2ba   : > { %v1791_v40 = vpop.f32.mrb[8].mxu1  ;;  %3923 = vmatprep.subr.bf16.mxu1 %v5546_v38  ;;  %v5619_v38 = vld [vmem:[%s6539_s28 + $0x548] ss:$16 sps:$4 sm:$0xff]  }
 0x2bb   : > { %v6787_v42 = vadd.f32 %v1791_v40, %v1751_v30  ;;  %v1793_v45 = vpop.f32.mrb[9].mxu1  ;;  %v5607_v30 = vld [vmem:[%s6539_s28 + $0x508] ss:$16 sps:$4 sm:$0xff]  }
 0x2bc   : > { %v1794_v46 = vadd.f32 %v1793_v45, %v1753_v34  ;;  %4088 = vmatpush1.bf16.msra.mxu0 %v5541_v39  ;;  %v1795_v47 = vpop.f32.mrb[10].mxu1  ;;  %v5615_v34 = vld [vmem:[%s6539_s28 + $0x52c] ss:$16 sps:$4 sm:$0xff]   ;;  %v5622_v39 = vld [vmem:[%s6539_s28 + $0x540] ss:$16 sps:$4 sm:$0xff]  }
 0x2bd   : > { %3924 = vmatpush1.bf16.msra.mxu1 %v5544_v21  ;;  %v1796_v51 = vpop.f32.mrb[11].mxu1  ;;  %4089 = vmatprep.subr.bf16.mxu0 %v5549_v22  ;;  %v5627_v21 = vld [vmem:[%s6539_s28 + $0x56c] ss:$16 sps:$4 sm:$0xff]   ;;  %v5630_v22 = vld [vmem:[%s6539_s28 + $0x564] ss:$16 sps:$4 sm:$0xff]  }
 0x2be   : > { %3925 = vmatprep.subr.bf16.mxu1 %v5552_v41  ;;  %v2295_v0 = vpack.c.bf16 %v1794_v46, %v1794_v46  ;;  %v5625_v40 = vld [vmem:[%s6539_s28 + $0x568] ss:$16 sps:$4 sm:$0xff]   ;;  %v5628_v41 = vld [vmem:[%s6539_s28 + $0x560] ss:$16 sps:$4 sm:$0xff]   ;;  %v5633_v45 = vld [vmem:[%s6539_s28 + $0x58c] ss:$16 sps:$4 sm:$0xff]  }
 0x2bf   : > { %v5636_v47 = vld [vmem:[%s6539_s28 + $0x584] ss:$16 sps:$4 sm:$0xff]  }
 0x2c0   : > { %4090 = vmatpush1.bf16.msra.mxu0 %v5547_v50 }
 0x2c1   : > { %3926 = vmatpush1.bf16.msra.mxu1 %v5550_v52  ;;  %4091 = vmatprep.subr.bf16.mxu0 %v5555_v53  ;;  %v5631_v53 = vld [vmem:[%s6539_s28 + $0x588] ss:$16 sps:$4 sm:$0xff]  }
 0x2c2   : > { %3927 = vmatprep.subr.bf16.mxu1 %v5558_v55 }
 0x2c4   : > { %4092 = vmatpush1.bf16.msra.mxu0 %v5553_v56  ;;  %v5634_v56 = vld [vmem:[%s6539_s28 + $0x580] ss:$16 sps:$4 sm:$0xff]  }
 0x2c5   : > { %3928 = vmatpush1.bf16.msra.mxu1 %v5556_v57  ;;  %4102 = vmatprep.subr.bf16.mxu0 %v5561_v58  ;;  %v5639_v58 = vld [vmem:[%s6539_s28 + $0x5ac] ss:$16 sps:$4 sm:$0xff]  }
 0x2c6   : > { %3938 = vmatprep.subr.bf16.mxu1 %v5564_v59  ;;  %v5642_v59 = vld [vmem:[%s6539_s28 + $0x5a4] ss:$16 sps:$4 sm:$0xff]  }
 0x2c7   : > { %4094 = vmatmul.mubr.bf16.vlgmr.msra.gmra.mrb[16].mxu0 %v2292_v61 }
 0x2c8   : > { %3930 = vmatmul.mubr.bf16.vlgmr.msra.gmra.mrb[20].mxu1 %v2292_v61  ;;  %4103 = vmatpush1.bf16.msra.mxu0 %v5559_v60  ;;  %v5637_v60 = vld [vmem:[%s6539_s28 + $0x5a8] ss:$16 sps:$4 sm:$0xff]  }
 0x2c9   : > { %4134 = vmatprep.mubr.bf16.mxu0 %v2295_v0  ;;  %3939 = vmatpush1.bf16.msra.mxu1 %v5562_v62 }
 0x2ca   : > { %3970 = vmatprep.mubr.bf16.mxu1 %v2295_v0  ;;  %4104 = vmatprep.subr.bf16.mxu0 %v5567_v63  ;;  %v5648_v63 = vld [vmem:[%s6539_s28 + $0x5c4] ss:$16 sps:$4 sm:$0xff]  }
 0x2cb   : > { %3940 = vmatprep.subr.bf16.mxu1 %v5570_v2 }
 0x2cc   : > { %4105 = vmatpush1.bf16.msra.mxu0 %v5565_v3 }
 0x2cd   : > { %3941 = vmatpush1.bf16.msra.mxu1 %v5568_v13  ;;  %4106 = vmatprep.subr.bf16.mxu0 %v5573_v1 }
 0x2ce   : > { %3942 = vmatprep.subr.bf16.mxu1 %v5576_v44  ;;  %v5643_v44 = vld [vmem:[%s6539_s28 + $0x5c8] ss:$16 sps:$4 sm:$0xff]  }
 0x2d0   : > { %4107 = vmatpush1.bf16.msra.mxu0 %v5571_v4 }
 0x2d1   : > { %3943 = vmatpush1.bf16.msra.mxu1 %v5574_v5  ;;  %4108 = vmatprep.subr.bf16.mxu0 %v5579_v48  ;;  %v5646_v5 = vld [vmem:[%s6539_s28 + $0x5c0] ss:$16 sps:$4 sm:$0xff]   ;;  %v5651_v48 = vld [vmem:[%s6539_s28 + $0x5ec] ss:$16 sps:$4 sm:$0xff]  }
 0x2d2   : > { %3944 = vmatprep.subr.bf16.mxu1 %v5582_v6  ;;  %v5654_v6 = vld [vmem:[%s6539_s28 + $0x5e4] ss:$16 sps:$4 sm:$0xff]  }
 0x2d4   : > { %4109 = vmatpush1.bf16.msra.mxu0 %v5577_v7  ;;  %v5649_v7 = vld [vmem:[%s6539_s28 + $0x5e8] ss:$16 sps:$4 sm:$0xff]  }
 0x2d5   : > { %3945 = vmatpush1.bf16.msra.mxu1 %v5580_v8  ;;  %4110 = vmatprep.subr.bf16.mxu0 %v5585_v9  ;;  %v5652_v8 = vld [vmem:[%s6539_s28 + $0x5e0] ss:$16 sps:$4 sm:$0xff]   ;;  %v5657_v9 = vld [vmem:[%s6539_s28 + $0x60c] ss:$16 sps:$4 sm:$0xff]  }
 0x2d6   : > { %3946 = vmatprep.subr.bf16.mxu1 %v5588_v43  ;;  %v5660_v43 = vld [vmem:[%s6539_s28 + $0x604] ss:$16 sps:$4 sm:$0xff]  }
 0x2d8   : > { %4111 = vmatpush1.bf16.msra.mxu0 %v5583_v54  ;;  %v5655_v54 = vld [vmem:[%s6539_s28 + $0x608] ss:$16 sps:$4 sm:$0xff]  }
 0x2d9   : > { %3947 = vmatpush1.bf16.msra.mxu1 %v5586_v10  ;;  %4112 = vmatprep.subr.bf16.mxu0 %v5591_v11  ;;  %v2294_v10 = vpack.c.bf16 %v6787_v42, %v6787_v42  ;;  %v5658_v11 = vld [vmem:[%s6539_s28 + $0x600] ss:$16 sps:$4 sm:$0xff]  }
 0x2da   : > { %3948 = vmatprep.subr.bf16.mxu1 %v5594_v12  ;;  %v5663_v12 = vld [vmem:[%s6539_s28 + $0x62c] ss:$16 sps:$4 sm:$0xff]   ;;  %v5664_v42 = vld [vmem:[%s6539_s28 + $0x620] ss:$16 sps:$4 sm:$0xff]  }
 0x2dc   : > { %4113 = vmatpush1.bf16.msra.mxu0 %v5589_v14 }
 0x2dd   : > { %3949 = vmatpush1.bf16.msra.mxu1 %v5592_v15  ;;  %4114 = vmatprep.subr.bf16.mxu0 %v5597_v16  ;;  %v5666_v15 = vld [vmem:[%s6539_s28 + $0x624] ss:$16 sps:$4 sm:$0xff]   ;;  %v5661_v16 = vld [vmem:[%s6539_s28 + $0x628] ss:$16 sps:$4 sm:$0xff]  }
 0x2de   : > { %3950 = vmatprep.subr.bf16.mxu1 %v5600_v17  ;;  %v5669_v17 = vld [vmem:[%s6539_s28 + $0x64c] ss:$16 sps:$4 sm:$0xff]  }
 0x2e0   : > { %4115 = vmatpush1.bf16.msra.mxu0 %v5595_v18  ;;  %v5672_v18 = vld [vmem:[%s6539_s28 + $0x644] ss:$16 sps:$4 sm:$0xff]  }
 0x2e1   : > { %3951 = vmatpush1.bf16.msra.mxu1 %v5598_v19  ;;  %4116 = vmatprep.subr.bf16.mxu0 %v5603_v20  ;;  %v5667_v19 = vld [vmem:[%s6539_s28 + $0x648] ss:$16 sps:$4 sm:$0xff]   ;;  %v5670_v20 = vld [vmem:[%s6539_s28 + $0x640] ss:$16 sps:$4 sm:$0xff]  }
 0x2e2   : > { %3952 = vmatprep.subr.bf16.mxu1 %v5606_v23  ;;  %v5675_v23 = vld [vmem:[%s6539_s28 + $0x66c] ss:$16 sps:$4 sm:$0xff]  }
 0x2e4   : > { %4117 = vmatpush1.bf16.msra.mxu0 %v5601_v24  ;;  %v5678_v24 = vld [vmem:[%s6539_s28 + $0x664] ss:$16 sps:$4 sm:$0xff]  }
 0x2e5   : > { %3953 = vmatpush1.bf16.msra.mxu1 %v5604_v25  ;;  %4118 = vmatprep.subr.bf16.mxu0 %v5609_v26  ;;  %v5673_v25 = vld [vmem:[%s6539_s28 + $0x668] ss:$16 sps:$4 sm:$0xff]   ;;  %v5676_v26 = vld [vmem:[%s6539_s28 + $0x660] ss:$16 sps:$4 sm:$0xff]  }
 0x2e6   : > { %3954 = vmatprep.subr.bf16.mxu1 %v5612_v29  ;;  %v5681_v29 = vld [vmem:[%s6539_s28 + $0x68c] ss:$16 sps:$4 sm:$0xff]  }
 0x2e8   : > { %4119 = vmatpush1.bf16.msra.mxu0 %v5607_v30  ;;  %v5684_v30 = vld [vmem:[%s6539_s28 + $0x684] ss:$16 sps:$4 sm:$0xff]  }
 0x2e9   : > { %3955 = vmatpush1.bf16.msra.mxu1 %v5610_v31  ;;  %4120 = vmatprep.subr.bf16.mxu0 %v5615_v34  ;;  %v5679_v31 = vld [vmem:[%s6539_s28 + $0x688] ss:$16 sps:$4 sm:$0xff]   ;;  %v5682_v34 = vld [vmem:[%s6539_s28 + $0x680] ss:$16 sps:$4 sm:$0xff]  }
 0x2ea   : > { %3956 = vmatprep.subr.bf16.mxu1 %v5618_v35  ;;  %v5687_v35 = vld [vmem:[%s6539_s28 + $0x6ac] ss:$16 sps:$4 sm:$0xff]  }
 0x2ec   : > { %4121 = vmatpush1.bf16.msra.mxu0 %v5613_v36  ;;  %v5690_v36 = vld [vmem:[%s6539_s28 + $0x6a4] ss:$16 sps:$4 sm:$0xff]  }
 0x2ed   : > { %3957 = vmatpush1.bf16.msra.mxu1 %v5616_v37  ;;  %4122 = vmatprep.subr.bf16.mxu0 %v5621_v49  ;;  %v5685_v37 = vld [vmem:[%s6539_s28 + $0x6a8] ss:$16 sps:$4 sm:$0xff]   ;;  %v5688_v49 = vld [vmem:[%s6539_s28 + $0x6a0] ss:$16 sps:$4 sm:$0xff]  }
 0x2ee   : > { %3958 = vmatprep.subr.bf16.mxu1 %v5624_v33  ;;  %v5693_v33 = vld [vmem:[%s6539_s28 + $0x6cc] ss:$16 sps:$4 sm:$0xff]  }
 0x2f0   : > { %4123 = vmatpush1.bf16.msra.mxu0 %v5619_v38 }
 0x2f1   : > { %3959 = vmatpush1.bf16.msra.mxu1 %v5622_v39  ;;  %4124 = vmatprep.subr.bf16.mxu0 %v5627_v21  ;;  %v5696_v21 = vld [vmem:[%s6539_s28 + $0x6c4] ss:$16 sps:$4 sm:$0xff]  }
 0x2f2   : > { %v1832_v46 = vpop.f32.mrb[8].mxu0  ;;  %3960 = vmatprep.subr.bf16.mxu1 %v5630_v22 }
 0x2f3   : > { %v1833_v50 = vadd.f32 %v1832_v46, %v6717_v27  ;;  %v1834_v51 = vpop.f32.mrb[9].mxu0  ;;  %v5640_v27 = vld [vmem:[%s6539_s28 + $0x5a0] ss:$16 sps:$4 sm:$0xff]  }
 0x2f4   : > { %v1835_v52 = vadd.f32 %v1834_v51, %v6719_v28  ;;  %4125 = vmatpush1.bf16.msra.mxu0 %v5625_v40  ;;  %v1836_v55 = vpop.f32.mrb[10].mxu0  ;;  %v5645_v28 = vld [vmem:[%s6539_s28 + $0x5cc] ss:$16 sps:$4 sm:$0xff]  }
 0x2f5   : > { %3961 = vmatpush1.bf16.msra.mxu1 %v5628_v41  ;;  %4126 = vmatprep.subr.bf16.mxu0 %v5633_v45  ;;  %v1837_v57 = vpop.f32.mrb[11].mxu0 }
 0x2f6   : > { %3962 = vmatprep.subr.bf16.mxu1 %v5636_v47  ;;  %v5691_v47 = vld [vmem:[%s6539_s28 + $0x6c8] ss:$16 sps:$4 sm:$0xff]   ;;  %v5702_v57 = vld [vmem:[%s6539_s28 + $0x6e4] ss:$16 sps:$4 sm:$0xff]  }
 0x2f8   : > { %4127 = vmatpush1.bf16.msra.mxu0 %v5631_v53  ;;  %v5699_v53 = vld [vmem:[%s6539_s28 + $0x6ec] ss:$16 sps:$4 sm:$0xff]  }
 0x2f9   : > { %3963 = vmatpush1.bf16.msra.mxu1 %v5634_v56  ;;  %4128 = vmatprep.subr.bf16.mxu0 %v5639_v58 }
 0x2fa   : > { %v1873_v61 = vpop.f32.mrb[12].mxu1  ;;  %v6856_v62 = vpop.f32.mrb[2].mxu0  ;;  %3964 = vmatprep.subr.bf16.mxu1 %v5642_v59  ;;  %v5697_v59 = vld [vmem:[%s6539_s28 + $0x6e8] ss:$16 sps:$4 sm:$0xff]  }
 0x2fb   : > { %v6859_v0 = vadd.f32 %v1873_v61, %v1833_v50  ;;  %v1875_v2 = vpop.f32.mrb[13].mxu1  ;;  %v4971_v3 = vpop.f32.mrb[3].mxu0  ;;  %v5703_v61 = vld [vmem:[%s6539_s28 + $0x708] ss:$16 sps:$4 sm:$0xff]  }
 0x2fc   : > { %v1876_v13 = vadd.f32 %v1875_v2, %v1835_v52  ;;  %4129 = vmatpush1.bf16.msra.mxu0 %v5637_v60  ;;  %v1877_v1 = vpop.f32.mrb[14].mxu1  ;;  %v5694_v52 = vld [vmem:[%s6539_s28 + $0x6c0] ss:$16 sps:$4 sm:$0xff]   ;;  %v5714_v2 = vld [vmem:[%s6539_s28 + $0x724] ss:$16 sps:$4 sm:$0xff]  }
 0x2fd   : > { %3965 = vmatpush1.bf16.msra.mxu1 %v5640_v27  ;;  %v1878_v4 = vpop.f32.mrb[15].mxu1  ;;  %4130 = vmatprep.subr.bf16.mxu0 %v5645_v28  ;;  %v5700_v60 = vld [vmem:[%s6539_s28 + $0x6e0] ss:$16 sps:$4 sm:$0xff]   ;;  %v5705_v27 = vld [vmem:[%s6539_s28 + $0x70c] ss:$16 sps:$4 sm:$0xff]  }
 0x2fe   : > { %3966 = vmatprep.subr.bf16.mxu1 %v5648_v63  ;;  %v2297_v14 = vpack.c.bf16 %v1876_v13, %v1876_v13  ;;  %v5708_v28 = vld [vmem:[%s6539_s28 + $0x704] ss:$16 sps:$4 sm:$0xff]   ;;  %v5711_v63 = vld [vmem:[%s6539_s28 + $0x72c] ss:$16 sps:$4 sm:$0xff]   ;;  %v5709_v3 = vld [vmem:[%s6539_s28 + $0x728] ss:$16 sps:$4 sm:$0xff]  }
 0x2ff   : > { %v5712_v13 = vld [vmem:[%s6539_s28 + $0x720] ss:$16 sps:$4 sm:$0xff]   ;;  %v5717_v1 = vld [vmem:[%s6539_s28 + $0x74c] ss:$16 sps:$4 sm:$0xff]   ;;  %v5715_v4 = vld [vmem:[%s6539_s28 + $0x748] ss:$16 sps:$4 sm:$0xff]  }
 0x300   : > { %4131 = vmatpush1.bf16.msra.mxu0 %v5643_v44  ;;  %v5720_v44 = vld [vmem:[%s6539_s28 + $0x744] ss:$16 sps:$4 sm:$0xff]  }
 0x301   : > { %3967 = vmatpush1.bf16.msra.mxu1 %v5646_v5  ;;  %4132 = vmatprep.subr.bf16.mxu0 %v5651_v48  ;;  %v5718_v5 = vld [vmem:[%s6539_s28 + $0x740] ss:$16 sps:$4 sm:$0xff]   ;;  %v5723_v48 = vld [vmem:[%s6539_s28 + $0x76c] ss:$16 sps:$4 sm:$0xff]  }
 0x302   : > { %3968 = vmatprep.subr.bf16.mxu1 %v5654_v6  ;;  %v5726_v6 = vld [vmem:[%s6539_s28 + $0x764] ss:$16 sps:$4 sm:$0xff]  }
 0x304   : > { %4133 = vmatpush1.bf16.msra.mxu0 %v5649_v7  ;;  %v5721_v7 = vld [vmem:[%s6539_s28 + $0x768] ss:$16 sps:$4 sm:$0xff]  }
 0x305   : > { %3969 = vmatpush1.bf16.msra.mxu1 %v5652_v8  ;;  %4143 = vmatprep.subr.bf16.mxu0 %v5657_v9  ;;  %v5724_v8 = vld [vmem:[%s6539_s28 + $0x760] ss:$16 sps:$4 sm:$0xff]   ;;  %v5729_v9 = vld [vmem:[%s6539_s28 + $0x78c] ss:$16 sps:$4 sm:$0xff]  }
 0x306   : > { %3979 = vmatprep.subr.bf16.mxu1 %v5660_v43  ;;  %v5732_v43 = vld [vmem:[%s6539_s28 + $0x784] ss:$16 sps:$4 sm:$0xff]  }
 0x307   : > { %4135 = vmatmul.mubr.bf16.vlgmr.msra.gmra.mrb[16].mxu0 %v2294_v10 }
 0x308   : > { %3971 = vmatmul.mubr.bf16.vlgmr.msra.gmra.mrb[20].mxu1 %v2294_v10  ;;  %4144 = vmatpush1.bf16.msra.mxu0 %v5655_v54  ;;  %v5727_v54 = vld [vmem:[%s6539_s28 + $0x788] ss:$16 sps:$4 sm:$0xff]   ;;  %v5730_v10 = vld [vmem:[%s6539_s28 + $0x780] ss:$16 sps:$4 sm:$0xff]  }
 0x309   : > { %4175 = vmatprep.mubr.bf16.mxu0 %v2297_v14  ;;  %3980 = vmatpush1.bf16.msra.mxu1 %v5658_v11  ;;  %v5735_v11 = vld [vmem:[%s6539_s28 + $0x7ac] ss:$16 sps:$4 sm:$0xff]  }
 0x30a   : > { %4011 = vmatprep.mubr.bf16.mxu1 %v2297_v14  ;;  %4145 = vmatprep.subr.bf16.mxu0 %v5663_v12  ;;  %v5738_v12 = vld [vmem:[%s6539_s28 + $0x7a4] ss:$16 sps:$4 sm:$0xff]   ;;  %v5733_v14 = vld [vmem:[%s6539_s28 + $0x7a8] ss:$16 sps:$4 sm:$0xff]  }
 0x30b   : > { %3981 = vmatprep.subr.bf16.mxu1 %v5666_v15  ;;  %v5736_v15 = vld [vmem:[%s6539_s28 + $0x7a0] ss:$16 sps:$4 sm:$0xff]  }
 0x30c   : > { %4146 = vmatpush1.bf16.msra.mxu0 %v5661_v16  ;;  %v5741_v16 = vld [vmem:[%s6539_s28 + $0x7cc] ss:$16 sps:$4 sm:$0xff]  }
 0x30d   : > { %3982 = vmatpush1.bf16.msra.mxu1 %v5664_v42  ;;  %4147 = vmatprep.subr.bf16.mxu0 %v5669_v17  ;;  %v5744_v42 = vld [vmem:[%s6539_s28 + $0x7c4] ss:$16 sps:$4 sm:$0xff]   ;;  %v5739_v17 = vld [vmem:[%s6539_s28 + $0x7c8] ss:$16 sps:$4 sm:$0xff]  }
 0x30e   : > { %3983 = vmatprep.subr.bf16.mxu1 %v5672_v18  ;;  %v5742_v18 = vld [vmem:[%s6539_s28 + $0x7c0] ss:$16 sps:$4 sm:$0xff]  }
 0x310   : > { %4148 = vmatpush1.bf16.msra.mxu0 %v5667_v19  ;;  %v5747_v19 = vld [vmem:[%s6539_s28 + $0x7ec] ss:$16 sps:$4 sm:$0xff]  }
 0x311   : > { %3984 = vmatpush1.bf16.msra.mxu1 %v5670_v20  ;;  %4149 = vmatprep.subr.bf16.mxu0 %v5675_v23  ;;  %v5750_v20 = vld [vmem:[%s6539_s28 + $0x7e4] ss:$16 sps:$4 sm:$0xff]   ;;  %v5745_v23 = vld [vmem:[%s6539_s28 + $0x7e8] ss:$16 sps:$4 sm:$0xff]  }
 0x312   : > { %3985 = vmatprep.subr.bf16.mxu1 %v5678_v24  ;;  %v5748_v24 = vld [vmem:[%s6539_s28 + $0x7e0] ss:$16 sps:$4 sm:$0xff]  }
 0x314   : > { %4150 = vmatpush1.bf16.msra.mxu0 %v5673_v25  ;;  %v2296_v25 = vpack.c.bf16 %v6859_v0, %v6859_v0 }
 0x315   : > { %3986 = vmatpush1.bf16.msra.mxu1 %v5676_v26  ;;  %4151 = vmatprep.subr.bf16.mxu0 %v5681_v29  ;;  %v2557_v26 = vshrl.u32 %v585_v32, 7 }
 0x316   : > { %3987 = vmatprep.subr.bf16.mxu1 %v5684_v30  ;;  %v2554_v30 = vld [vmem:[%s522_s24] sm:$0xf] }
 0x317   : > { %v2566_v29 = vsub.s32 2, %v2557_v26 }
 0x318   : > { %4152 = vmatpush1.bf16.msra.mxu0 %v5679_v31  ;;  %v2558_v31 = vsub.s32 0, %v2557_v26 }
 0x319   : > { %3988 = vmatpush1.bf16.msra.mxu1 %v5682_v34  ;;  %4153 = vmatprep.subr.bf16.mxu0 %v5687_v35  ;;  %v2570_v34 = vsub.s32 3, %v2557_v26  ;;  %v2562_v35 = vsub.s32 1, %v2557_v26 }
 0x31a   : > { %v4939_v38 = vpop.f32.mrb[16].mxu1  ;;  %3989 = vmatprep.subr.bf16.mxu1 %v5690_v36  ;;  %v4961_v39 = vpop.f32.mrb[12].mxu0  ;;  %v2567_v36 = vrot.slane %v2554_v30, %v2566_v29 }
 0x31b   : > { %v4940_v22 = vpop.f32.mrb[17].mxu1  ;;  %v4962_v40 = vpop.f32.mrb[13].mxu0 }
 0x31c   : > { %v4941_v41 = vadd.f32 %v4940_v22, %v4939_v38  ;;  %4154 = vmatpush1.bf16.msra.mxu0 %v5685_v37  ;;  %v4942_v45 = vpop.f32.mrb[18].mxu1  ;;  %v4963_v46 = vadd.f32 %v4962_v40, %v4961_v39  ;;  %v4964_v50 = vpop.f32.mrb[14].mxu0  ;;  %v2559_v37 = vrot.slane %v2554_v30, %v2558_v31 }
 0x31d   : > { %3990 = vmatpush1.bf16.msra.mxu1 %v5688_v49  ;;  %v4943_v51 = vpop.f32.mrb[19].mxu1  ;;  %4155 = vmatprep.subr.bf16.mxu0 %v5693_v33  ;;  %v4965_v55 = vpop.f32.mrb[15].mxu0  ;;  %v2571_v49 = vrot.slane %v2554_v30, %v2570_v34  ;;  %v2563_v33 = vrot.slane %v2554_v30, %v2562_v35 }
 0x31e   : > { %v2245_v56 = vadd.f32 %v4941_v41, %v6856_v62  ;;  %3991 = vmatprep.subr.bf16.mxu1 %v5696_v21  ;;  %v5706_v62 = vld [vmem:[%s6539_s28 + $0x700] ss:$16 sps:$4 sm:$0xff]   ;;  %s6005_s28 = scalar_lea.vmem %s6004_s19, 128 }
 0x31f   : > { %p6007_p8 = scmp.lt.s32.totalorder %s6005_s28, %s5999_s16 }
 0x320   : > { %v6900_v58 = vadd.f32 %v4963_v46, %v2245_v56  ;;  %4156 = vmatpush1.bf16.msra.mxu0 %v5691_v47 }
 0x321   : > { %3992 = vmatpush1.bf16.msra.mxu1 %v5694_v52  ;;  %4157 = vmatprep.subr.bf16.mxu0 %v5699_v53  ;;  %p6008_p7 = por %p6007_p8, %p6006_p0 }
 0x322   : > { %3993 = vmatprep.subr.bf16.mxu1 %v5702_v57 }
 0x323   : > { %p6009_p3 = pnand %p6008_p7, %p6002_p13 }
 0x324   : > { %4158 = vmatpush1.bf16.msra.mxu0 %v5697_v59 }
 0x325   : > { %3994 = vmatpush1.bf16.msra.mxu1 %v5700_v60  ;;  %4159 = vmatprep.subr.bf16.mxu0 %v5705_v27 }
 0x326   : > { %3995 = vmatprep.subr.bf16.mxu1 %v5708_v28 }
 0x328   : > { %4160 = vmatpush1.bf16.msra.mxu0 %v5703_v61 }
 0x329   : > { %3996 = vmatpush1.bf16.msra.mxu1 %v5706_v62  ;;  %4161 = vmatprep.subr.bf16.mxu0 %v5711_v63 }
 0x32a   : > { %3997 = vmatprep.subr.bf16.mxu1 %v5714_v2 }
 0x32c   : > { %4162 = vmatpush1.bf16.msra.mxu0 %v5709_v3 }
 0x32d   : > { %3998 = vmatpush1.bf16.msra.mxu1 %v5712_v13  ;;  %4163 = vmatprep.subr.bf16.mxu0 %v5717_v1 }
 0x32e   : > { %3999 = vmatprep.subr.bf16.mxu1 %v5720_v44 }
 0x330   : > { %4164 = vmatpush1.bf16.msra.mxu0 %v5715_v4 }
 0x331   : > { %4000 = vmatpush1.bf16.msra.mxu1 %v5718_v5  ;;  %4165 = vmatprep.subr.bf16.mxu0 %v5723_v48 }
 0x332   : > { %4001 = vmatprep.subr.bf16.mxu1 %v5726_v6 }
 0x334   : > { %4166 = vmatpush1.bf16.msra.mxu0 %v5721_v7 }
 0x335   : > { %4002 = vmatpush1.bf16.msra.mxu1 %v5724_v8  ;;  %4167 = vmatprep.subr.bf16.mxu0 %v5729_v9 }
 0x336   : > { %4003 = vmatprep.subr.bf16.mxu1 %v5732_v43 }
 0x338   : > { %4168 = vmatpush1.bf16.msra.mxu0 %v5727_v54 }
 0x339   : > { %4004 = vmatpush1.bf16.msra.mxu1 %v5730_v10  ;;  %4169 = vmatprep.subr.bf16.mxu0 %v5735_v11 }
 0x33a   : > { %4005 = vmatprep.subr.bf16.mxu1 %v5738_v12 }
 0x33c   : > { %4170 = vmatpush1.bf16.msra.mxu0 %v5733_v14 }
 0x33d   : > { %4006 = vmatpush1.bf16.msra.mxu1 %v5736_v15  ;;  %4171 = vmatprep.subr.bf16.mxu0 %v5741_v16 }
 0x33e   : > { %4007 = vmatprep.subr.bf16.mxu1 %v5744_v42 }
 0x340   : > { %4172 = vmatpush1.bf16.msra.mxu0 %v5739_v17 }
 0x341   : > { %4008 = vmatpush1.bf16.msra.mxu1 %v5742_v18  ;;  %4173 = vmatprep.subr.bf16.mxu0 %v5747_v19 }
 0x342   : > { %4009 = vmatprep.subr.bf16.mxu1 %v5750_v20 }
 0x344   : > { %4174 = vmatpush1.bf16.msra.mxu0 %v5745_v23 }
 0x345   : > { %4010 = vmatpush1.bf16.msra.mxu1 %v5748_v24 }
 0x347   : > { %4176 = vmatmul.mubr.bf16.vlgmr.msra.gmra.mrb[16].mxu0 %v2296_v25 }
 0x348   : > { %4012 = vmatmul.mubr.bf16.vlgmr.msra.gmra.mrb[20].mxu1 %v2296_v25 }
 0x41a   : > { %v4177_v38 = vpop.f32.mrb[16].mxu0 }
 0x41b   : > { %v4994_v39 = vadd.f32 %v4177_v38, %v2567_v36  ;;  %v4013_v21 = vpop.f32.mrb[20].mxu1  ;;  %v4179_v22 = vpop.f32.mrb[17].mxu0 }
 0x41c   : > { %v4992_v0 = vadd.f32 %v4013_v21, %v2559_v37  ;;  %v4995_v40 = vadd.f32 %v4179_v22, %v2571_v49  ;;  %v4015_v41 = vpop.f32.mrb[21].mxu1  ;;  %v4181_v45 = vpop.f32.mrb[18].mxu0 }
 0x41d   : > { %v4993_v46 = vadd.f32 %v4015_v41, %v2563_v33  ;;  %v4017_v32 = vpop.f32.mrb[22].mxu1  ;;  %v4182_v47 = vpop.f32.mrb[19].mxu0 }
 0x41e   : > { %v4910_v50 = vmul.f32 -1.442695, %v4992_v0  ;;  %v4018_v51 = vpop.f32.mrb[23].mxu1  ;;  %v4912_v53 = vmul.f32 -1.442695, %v4995_v40 }
 0x41f   : > { %v4911_v52 = vmul.f32 -1.442695, %v4993_v46 }
 0x420   : > { %5751 = vpow2.f32 %v4910_v50 }
 0x421   : > { %5753 = vpow2.f32 %v4911_v52 }
 0x422   : > { %5755 = vtanh.f32 %v4994_v39 }
 0x423   : > { %5757 = vpow2.f32 %v4912_v53 }
 0x42a   : > { %v5752_v55 = vpop.eup %5751 }
 0x42b   : > { %v4187_v56 = vadd.f32 1.0, %v5752_v55  ;;  %v5754_v57 = vpop.eup %5753 }
 0x42c   : > { %v4193_v59 = vadd.f32 1.0, %v5754_v57  ;;  %v5756_v60 = vpop.eup %5755 }
 0x42d   : > { %5759 = vrcp.f32 %v4187_v56  ;;  %v5758_v27 = vpop.eup %5757 }
 0x42e   : > { %5761 = vrcp.f32 %v4193_v59  ;;  %v4200_v63 = vadd.f32 1.0, %v5758_v27 }
 0x430   : > { %5763 = vrcp.f32 %v4200_v63 }
 0x437   : > { %v5760_v28 = vpop.eup %5759 }
 0x438   : > { %v4204_v61 = vmul.f32 %v5760_v28, %v5756_v60  ;;  %v5762_v62 = vpop.eup %5761 }
 0x439   : > { %v4203_v2 = vmul.f32 %v5762_v62, %v6900_v58 }
 0x43b   : > { %v4205_v3 = vadd.f32 %v4204_v61, %v4203_v2 }
 0x43d   : > { %5765 = vtanh.f32 %v4205_v3  ;;  %4209 = vst [vmem:[%s580_s3] sm:$0xf] %v4205_v3 }
 0x43e   : > { %6012 = shalt.err (!%p6009_p3)
}
 0x43f   : > { %s6013_s29 = scalar_lea.hbm %s6949_s25, 64  ;;  %s6017_s27 = scalar_lea.hbm %s7110_s14, 256 }
 0x440   : > { %p6014_p12 = scmp.ne.s32.totalorder %s6949_s25, %s6013_s29  ;;  %p6018_p10 = scmp.lt.u32.totalorder %s6949_s25, %s7110_s14 }
 0x441   : > { %p6019_p9 = scmp.lt.u32.totalorder %s6017_s27, %s6013_s29  ;;  %p6021_p5 = scmp.lt.u32.totalorder %s6013_s29, %s6949_s25 }
 0x442   : > { %p6015_p2 = pnand %p6014_p12, %p7111_p11 }
 0x443   : > { %p6020_p1 = por %p6019_p9, %p6018_p10 }
 0x444   : > { %p6016_p6 = pneg %p6015_p2 }
 0x445   : > { %p6022_p4 = por %p6021_p5, %p6020_p1 }
 0x447   : > { %p6023_p13 = pnand %p6022_p4, %p6016_p6 }
 0x449   : > { %6026 = shalt.err (!%p6023_p13)
}
 0x44a   : > { %5045 = dma.vmem_to_hbm [thread:$0]  (%p7111_p11), %s6951_s0, 64, %s6949_s25, %s4216_s23   ;;  %v5764_v58 = vpop.eup %5763 }
 0x44b   : > { %s573_s17 = scalar_lea.vmem [#allocation16], %s6520_s12  ;;  %v5766_v13 = vpop.eup %5765  ;;  %s7112_s26 = sld [smem:[#allocation39_spill]] }
 0x44c   : > { %s4229_s6 = sshll.u32 %s573_s17, 4  ;;  %v4207_v1 = vmul.f32 %v5766_v13, %v5764_v58  ;;  %s4211_s11 = scalar_lea.sflag [#allocation4], %s6517_s15  ;;  %s6983_s6 = int_to_ptr.vmem [resolvable:$true] %s4229_s6 }
 0x44d   : > { %s6027_s19 = scalar_lea.vmem %s6983_s6, 64  ;;  %s6139_s12 = smov [#allocation16]  }
 0x44e   : > { %4208 = vst [vmem:[%s573_s17] sm:$0xf] %v4207_v1  ;;  %p6028_p0 = scmp.ne.s32.totalorder %s6983_s6, %s6027_s19  ;;  %s6031_s0 = sshll.u32 %s6139_s12, 4  ;;  %s6032_s0 = int_to_ptr.vmem [resolvable:$false] %s6031_s0 }
 0x44f   : > { %s6033_s21 = scalar_lea.vmem %s6032_s0, 128  ;;  %p6034_p3 = scmp.lt.s32.totalorder %s6983_s6, %s6032_s0 }
 0x450   : > { %p6029_p8 = pnand %p6028_p0, %p7111_p11  ;;  %p6035_p12 = scmp.lt.s32.totalorder %s6033_s21, %s6027_s19 }
 0x451   : > { %s6981_s16 = scalar_lea.hbm %s7112_s26, %s4915_s13 }
 0x452   : > { %p6030_p7 = pneg %p6029_p8  ;;  %p6036_p2 = por %p6035_p12, %p6034_p3 }
 0x454   : > { %p6037_p6 = pnand %p6036_p2, %p6030_p7 }
 0x456   : > { %6040 = shalt.err (!%p6037_p6)
}
 0x457   : > { %s6041_s15 = scalar_lea.hbm %s6981_s16, 64  ;;  %s6045_s23 = scalar_lea.hbm %s7112_s26, 256 }
 0x458   : > { %p6042_p10 = scmp.ne.s32.totalorder %s6981_s16, %s6041_s15  ;;  %p6046_p5 = scmp.lt.u32.totalorder %s6981_s16, %s7112_s26 }
 0x459   : > { %p6047_p4 = scmp.lt.u32.totalorder %s6045_s23, %s6041_s15  ;;  %p6049_p0 = scmp.lt.u32.totalorder %s6041_s15, %s6981_s16 }
 0x45a   : > { %p6043_p9 = pnand %p6042_p10, %p7111_p11 }
 0x45b   : > { %p6048_p13 = por %p6047_p4, %p6046_p5 }
 0x45c   : > { %p6044_p1 = pneg %p6043_p9 }
 0x45d   : > { %p6050_p8 = por %p6049_p0, %p6048_p13 }
 0x45f   : > { %p6051_p7 = pnand %p6050_p8, %p6044_p1 }
 0x461   : > { %6054 = shalt.err (!%p6051_p7)
}
 0x462   : > { %5044 = dma.vmem_to_hbm [thread:$0]  (%p7111_p11), %s6983_s6, 64, %s6981_s16, %s4211_s11  }
 0x463 PF: > { %s7113_s24 = sld [smem:[#allocation27_spill]]  ;;  %s7114_s10 = sld [smem:[#allocation33_spill]] }
 0x464   : > { %p5090_p3 = scmp.ge.s32.totalorder %s6117_s20, 2 }
 0x469   : > { %s4254_s27 = sand.u32 1, %s7113_s24   ;;  %p7115_p12 = scmp.ne.s32.totalorder %s7114_s10, 0 }
 0x46a   : > { %s4255_s22 = scalar_lea.sflag [#allocation4], %s4254_s27 }
 0x46b   : > { %p5075_p2 = pnand %p5090_p3, %p7115_p12 }
 0x46d   : > { %6096 = dma.done.wait (!%p5075_p2), %s4255_s22, 64  }
 0x46e   : > { %6098 = vsyncadd (!%p5075_p2), %s4255_s22, 4294967232  ;;  %s4264_s7 = scalar_lea.sflag [#allocation18], %s4254_s27 }
 0x46f   : > { %6100 = dma.done.wait (!%p5075_p2), %s4264_s7, 64  }
 0x470   : > { %6102 = vsyncadd (!%p5075_p2), %s4264_s7, 4294967232  ;;  %s7116_s20 = sld [smem:[#allocation29_spill]]  ;;  %s7117_s30 = sld [smem:[#allocation28_spill]] }
 0x471   : > { %s7118_s19 = sld [smem:[#allocation30_spill]]  ;;  %s7119_s17 = smov %s6109_s18 }
 0x476   : > { %p36_p11 = scmp.ge.s32.totalorder %s7116_s20, 6   ;;  %s7120_s18 = smov %s7117_s30 }
 0x478   :  { %38 = sbr.rel (!%p36_p11) target bundleno = 21 (0x15), region = 176 }
 0x47f   :  { %4269 = vsyncpa [#allocation3], 1 }
 0x480   :  { %4271 = vsyncpa [#allocation3 + $0x1], 1 }
 0x481   :  { %4272 = vsyncpa [#allocation6], 1 }
 0x482   :  { %4273 = vsyncpa [#allocation9], 1 }
 0x483   :  { %4275 = vsyncpa [#allocation9 + $0x1], 1 }
 0x484   :  { %4276 = vsyncpa [#allocation12], 1 }
 0x485   :  { %4278 = vsyncpa [#allocation12 + $0x1], 1 }
 0x486   :  { %4279 = vsyncpa [#allocation15], 1 }
 0x487   :  { %4281 = vsyncpa [#allocation15 + $0x1], 1 }
 0x488   :  { %4282 = vsyncpa [#allocation4], 1 }
 0x489   :  { %4284 = vsyncpa [#allocation4 + $0x1], 1 }
 0x48a   :  { %4285 = vsyncpa [#allocation18], 1 }
 0x48b   :  { %4287 = vsyncpa [#allocation18 + $0x1], 1 }

</bundles_post_ra>
